<compile_context>
chip_gen: v6e
topology: v6e:2x2x1
jax: 0.10.0
libtpu: 0.0.40
codegen_flags: <defaults>
</compile_context>

<pallas_src>
import functools

import jax
import jax.numpy as jnp
from jax import lax
from jax.experimental import pallas as pl
from jax.experimental.pallas import tpu as pltpu


def transformer_block_kernel(
    x_ref,
    wq_ref, bq_ref, wk_ref, bk_ref, wv_ref, bv_ref, wo_ref, bo_ref,
    g1_ref, beta1_ref,
    w1_ref, bf1_ref, w2_ref, bf2_ref,
    g2_ref, beta2_ref,
    o_ref,
    *, num_heads, head_dim, block_b, seq_len, emb):
    # (TB, S, E) block -> work on a (TB*S, E) 2-D view so every projection /
    # FFN matmul feeds TB*S rows to the MXU instead of only S.
    x = x_ref[...].reshape(block_b * seq_len, emb)           # f32 residual
    xb = x.astype(jnp.bfloat16)

    def linear(v_bf16, w_ref, b_ref):
        # Weights were pre-transposed to (in, out) and pre-cast to bf16 in the
        # wrapper: plain row-major matmul, f32 accumulation, f32 bias add.
        return jnp.dot(v_bf16, w_ref[...],
                       preferred_element_type=jnp.float32) + b_ref[...]

    # --- Multi-head self attention -------------------------------------
    inv_scale = 1.0 / (float(head_dim) ** 0.5)
    q = linear(xb, wq_ref, bq_ref) * inv_scale   # fold 1/sqrt(D) into q
    k = linear(xb, wk_ref, bk_ref)
    v = linear(xb, wv_ref, bv_ref)

    q3 = q.reshape(block_b, seq_len, emb).astype(jnp.bfloat16)
    k3 = k.reshape(block_b, seq_len, emb).astype(jnp.bfloat16)
    v3 = v.reshape(block_b, seq_len, emb).astype(jnp.bfloat16)

    head_outs = []
    for h in range(num_heads):                   # static loop over heads
        lo = h * head_dim
        hi = lo + head_dim
        q_h = q3[:, :, lo:hi]                    # (TB, S, D) bf16
        k_h = k3[:, :, lo:hi]
        v_h = v3[:, :, lo:hi]
        # energy[b, q, k] = <q_h[b, q], k_h[b, k]>   (scale already in q)
        energy = jnp.einsum('bqd,bkd->bqk', q_h, k_h,
                            preferred_element_type=jnp.float32)   # (TB,S,S)
        # softmax kept in f32 (mandatory on v5e: no bf16 VPU/EUP paths)
        m = jnp.max(energy, axis=-1, keepdims=True)
        p = jnp.exp(energy - m)
        denom = jnp.sum(p, axis=-1, keepdims=True)
        attn = p * pl.reciprocal(denom, approx=True)
        out_h = jnp.einsum('bqk,bkd->bqd', attn.astype(jnp.bfloat16), v_h,
                           preferred_element_type=jnp.float32)    # (TB,S,D)
        head_outs.append(out_h)
    attn_out = jnp.concatenate(head_outs, axis=-1)                # (TB,S,E)
    attn_out = attn_out.reshape(block_b * seq_len, emb)
    attn_out = linear(attn_out.astype(jnp.bfloat16), wo_ref, bo_ref)  # fc_out

    def layer_norm(val, g_ref, b_ref, eps=1e-5):
        # single-pass statistics (E[x^2] - E[x]^2), all in f32
        mean = jnp.mean(val, axis=-1, keepdims=True)
        mean_sq = jnp.mean(val * val, axis=-1, keepdims=True)
        var = mean_sq - mean * mean
        return (val - mean) * lax.rsqrt(var + eps) * g_ref[...] + b_ref[...]

    # residual + norm1
    x1 = layer_norm(attn_out + x, g1_ref, beta1_ref)

    # --- FeedForward: fc2(dropout(relu(fc1(x)))) ------------------------
    # TODO(synk): dropout is identity here (eval-mode semantics; no RNG drop).
    h1 = jnp.maximum(linear(x1.astype(jnp.bfloat16), w1_ref, bf1_ref), 0.0)
    ff = linear(h1.astype(jnp.bfloat16), w2_ref, bf2_ref)

    # residual + norm2
    x2 = layer_norm(ff + x1, g2_ref, beta2_ref)
    o_ref[...] = x2.reshape(block_b, seq_len, emb).astype(o_ref.dtype)


def _pick_block_batch(B, S, row_target=512):
    """Largest divisor of B whose (TB*S) row count stays under row_target."""
    best = 1
    for tb in range(1, B + 1):
        if B % tb == 0 and tb * S <= row_target:
            best = tb
    return best


def transformer_block(x, params, num_heads):
    B, S, E = x.shape
    head_dim = E // num_heads

    (wq, bq, wk, bk, wv, bv, wo, bo,
     g1, beta1, w1, bf1, w2, bf2, g2, beta2) = params

    # One-time host/XLA-side prep: PyTorch (out, in) weights -> (in, out),
    # MXU operands cast to bf16; biases / LayerNorm params stay f32.
    prep = [
        wq.T.astype(jnp.bfloat16), bq,
        wk.T.astype(jnp.bfloat16), bk,
        wv.T.astype(jnp.bfloat16), bv,
        wo.T.astype(jnp.bfloat16), bo,
        g1, beta1,
        w1.T.astype(jnp.bfloat16), bf1,
        w2.T.astype(jnp.bfloat16), bf2,
        g2, beta2,
    ]

    TB = _pick_block_batch(B, S)
    grid = (B // TB,)

    def full_spec(p):
        n = p.ndim
        return pl.BlockSpec(p.shape, lambda b, _n=n: (0,) * _n)

    in_specs = [pl.BlockSpec((TB, S, E), lambda b: (b, 0, 0))]
    in_specs += [full_spec(p) for p in prep]

    kernel = functools.partial(
        transformer_block_kernel, num_heads=num_heads, head_dim=head_dim,
        block_b=TB, seq_len=S, emb=E)

    return pl.pallas_call(
        kernel,
        out_shape=jax.ShapeDtypeStruct((B, S, E), jnp.float32),
        grid_spec=pltpu.PrefetchScalarGridSpec(
            num_scalar_prefetch=0,
            grid=grid,
            in_specs=in_specs,
            out_specs=pl.BlockSpec((TB, S, E), lambda b: (b, 0, 0)),
        ),
        compiler_params=pltpu.CompilerParams(
            dimension_semantics=("parallel",)),
    )(x, *prep)


def init_params(key, emb_size, num_heads, ff_hidden_size):
    ks = jax.random.split(key, 12)

    def w(k, shape, scale=0.05):
        return (scale * jax.random.normal(k, shape)).astype(jnp.float32)

    params = [
        # attention: query, key, value, fc_out (PyTorch layout (out, in), bias (1, out))
        w(ks[0], (emb_size, emb_size)), w(ks[1], (1, emb_size)),
        w(ks[2], (emb_size, emb_size)), w(ks[3], (1, emb_size)),
        w(ks[4], (emb_size, emb_size)), w(ks[5], (1, emb_size)),
        w(ks[6], (emb_size, emb_size)), w(ks[7], (1, emb_size)),
        # norm1 gamma, beta
        jnp.ones((1, emb_size), jnp.float32), jnp.zeros((1, emb_size), jnp.float32),
        # feedforward fc1 (ffH, E), b1 (1, ffH); fc2 (E, ffH), b2 (1, E)
        w(ks[8], (ff_hidden_size, emb_size)), w(ks[9], (1, ff_hidden_size)),
        w(ks[10], (emb_size, ff_hidden_size)), w(ks[11], (1, emb_size)),
        # norm2 gamma, beta
        jnp.ones((1, emb_size), jnp.float32), jnp.zeros((1, emb_size), jnp.float32),
    ]
    return params


if __name__ == "__main__":
    B, S, E = 2, 8, 128          # lane-dense embedding (multiple of 128)
    NUM_HEADS = 4                # head_dim = 32
    FF_HIDDEN = 256

    key = jax.random.PRNGKey(0)
    k_x, k_p = jax.random.split(key)
    x = jax.random.normal(k_x, (B, S, E), dtype=jnp.float32)
    params = init_params(k_p, E, NUM_HEADS, FF_HIDDEN)

    out = transformer_block(x, params, NUM_HEADS)
    jax.block_until_ready(out)
    assert out.shape == (B, S, E)
    print("KERNEL_OK")
</pallas_src>

<mosaic_0001>
module attributes {stable_mosaic.version = 11 : i64} {
  func.func @transformer_block_kernel(%arg0: i32, %arg1: memref<2x8x128xf32, #tpu.memory_space<vmem>>, %arg2: memref<128x128xbf16, #tpu.memory_space<vmem>>, %arg3: memref<1x128xf32, #tpu.memory_space<vmem>>, %arg4: memref<128x128xbf16, #tpu.memory_space<vmem>>, %arg5: memref<1x128xf32, #tpu.memory_space<vmem>>, %arg6: memref<128x128xbf16, #tpu.memory_space<vmem>>, %arg7: memref<1x128xf32, #tpu.memory_space<vmem>>, %arg8: memref<128x128xbf16, #tpu.memory_space<vmem>>, %arg9: memref<1x128xf32, #tpu.memory_space<vmem>>, %arg10: memref<1x128xf32, #tpu.memory_space<vmem>>, %arg11: memref<1x128xf32, #tpu.memory_space<vmem>>, %arg12: memref<128x256xbf16, #tpu.memory_space<vmem>>, %arg13: memref<1x256xf32, #tpu.memory_space<vmem>>, %arg14: memref<256x128xbf16, #tpu.memory_space<vmem>>, %arg15: memref<1x128xf32, #tpu.memory_space<vmem>>, %arg16: memref<1x128xf32, #tpu.memory_space<vmem>>, %arg17: memref<1x128xf32, #tpu.memory_space<vmem>>, %arg18: memref<2x8x128xf32, #tpu.memory_space<vmem>>) attributes {dimension_semantics = [#tpu.dimension_semantics<parallel>], iteration_bounds = array<i64: 1>, scalar_prefetch = 0 : i64, scratch_operands = 0 : i64, tpu.core_type = #tpu.core_type<tc>, window_params = [{transform_indices = @transform_0, window_bounds = array<i64: 2, 8, 128>}, {pipeline_mode = #tpu.pipeline_mode<synchronous>, transform_indices = @transform_1, window_bounds = array<i64: 128, 128>}, {pipeline_mode = #tpu.pipeline_mode<synchronous>, transform_indices = @transform_2, window_bounds = array<i64: 1, 128>}, {pipeline_mode = #tpu.pipeline_mode<synchronous>, transform_indices = @transform_3, window_bounds = array<i64: 128, 128>}, {pipeline_mode = #tpu.pipeline_mode<synchronous>, transform_indices = @transform_4, window_bounds = array<i64: 1, 128>}, {pipeline_mode = #tpu.pipeline_mode<synchronous>, transform_indices = @transform_5, window_bounds = array<i64: 128, 128>}, {pipeline_mode = #tpu.pipeline_mode<synchronous>, transform_indices = @transform_6, window_bounds = array<i64: 1, 128>}, {pipeline_mode = #tpu.pipeline_mode<synchronous>, transform_indices = @transform_7, window_bounds = array<i64: 128, 128>}, {pipeline_mode = #tpu.pipeline_mode<synchronous>, transform_indices = @transform_8, window_bounds = array<i64: 1, 128>}, {pipeline_mode = #tpu.pipeline_mode<synchronous>, transform_indices = @transform_9, window_bounds = array<i64: 1, 128>}, {pipeline_mode = #tpu.pipeline_mode<synchronous>, transform_indices = @transform_10, window_bounds = array<i64: 1, 128>}, {pipeline_mode = #tpu.pipeline_mode<synchronous>, transform_indices = @transform_11, window_bounds = array<i64: 128, 256>}, {pipeline_mode = #tpu.pipeline_mode<synchronous>, transform_indices = @transform_12, window_bounds = array<i64: 1, 256>}, {pipeline_mode = #tpu.pipeline_mode<synchronous>, transform_indices = @transform_13, window_bounds = array<i64: 256, 128>}, {pipeline_mode = #tpu.pipeline_mode<synchronous>, transform_indices = @transform_14, window_bounds = array<i64: 1, 128>}, {pipeline_mode = #tpu.pipeline_mode<synchronous>, transform_indices = @transform_15, window_bounds = array<i64: 1, 128>}, {pipeline_mode = #tpu.pipeline_mode<synchronous>, transform_indices = @transform_16, window_bounds = array<i64: 1, 128>}, {transform_indices = @transform_17, window_bounds = array<i64: 2, 8, 128>}]} {
    %c0 = arith.constant 0 : index
    %c0_0 = arith.constant 0 : index
    %c0_1 = arith.constant 0 : index
    %0 = vector.load %arg1[%c0, %c0_0, %c0_1] : memref<2x8x128xf32, #tpu.memory_space<vmem>>, vector<2x8x128xf32>
    %1 = vector.shape_cast %0 : vector<2x8x128xf32> to vector<16x128xf32>
    %2 = arith.truncf %1 : vector<16x128xf32> to vector<16x128xbf16>
    %c0_2 = arith.constant 0 : index
    %c0_3 = arith.constant 0 : index
    %3 = vector.load %arg2[%c0_2, %c0_3] : memref<128x128xbf16, #tpu.memory_space<vmem>>, vector<128x128xbf16>
    %cst = arith.constant dense<0.000000e+00> : vector<16x128xf32>
    %4 = tpu.matmul %2, %3, %cst {dimension_numbers = #tpu.dot_dimension_numbers<[1], [0], [0], [1], [0, 0, 1, 1], [], []>} : vector<16x128xbf16>, vector<128x128xbf16>, vector<16x128xf32> -> vector<16x128xf32>
    %c0_4 = arith.constant 0 : index
    %c0_5 = arith.constant 0 : index
    %5 = vector.load %arg3[%c0_4, %c0_5] : memref<1x128xf32, #tpu.memory_space<vmem>>, vector<1x128xf32>
    %6 = vector.broadcast %5 : vector<1x128xf32> to vector<16x128xf32>
    %7 = arith.addf %4, %6 : vector<16x128xf32>
    %cst_6 = arith.constant 0.176776692 : f32
    %8 = vector.broadcast %cst_6 : f32 to vector<16x128xf32>
    %9 = arith.mulf %7, %8 : vector<16x128xf32>
    %c0_7 = arith.constant 0 : index
    %c0_8 = arith.constant 0 : index
    %10 = vector.load %arg4[%c0_7, %c0_8] : memref<128x128xbf16, #tpu.memory_space<vmem>>, vector<128x128xbf16>
    %cst_9 = arith.constant dense<0.000000e+00> : vector<16x128xf32>
    %11 = tpu.matmul %2, %10, %cst_9 {dimension_numbers = #tpu.dot_dimension_numbers<[1], [0], [0], [1], [0, 0, 1, 1], [], []>} : vector<16x128xbf16>, vector<128x128xbf16>, vector<16x128xf32> -> vector<16x128xf32>
    %c0_10 = arith.constant 0 : index
    %c0_11 = arith.constant 0 : index
    %12 = vector.load %arg5[%c0_10, %c0_11] : memref<1x128xf32, #tpu.memory_space<vmem>>, vector<1x128xf32>
    %13 = vector.broadcast %12 : vector<1x128xf32> to vector<16x128xf32>
    %14 = arith.addf %11, %13 : vector<16x128xf32>
    %c0_12 = arith.constant 0 : index
    %c0_13 = arith.constant 0 : index
    %15 = vector.load %arg6[%c0_12, %c0_13] : memref<128x128xbf16, #tpu.memory_space<vmem>>, vector<128x128xbf16>
    %cst_14 = arith.constant dense<0.000000e+00> : vector<16x128xf32>
    %16 = tpu.matmul %2, %15, %cst_14 {dimension_numbers = #tpu.dot_dimension_numbers<[1], [0], [0], [1], [0, 0, 1, 1], [], []>} : vector<16x128xbf16>, vector<128x128xbf16>, vector<16x128xf32> -> vector<16x128xf32>
    %c0_15 = arith.constant 0 : index
    %c0_16 = arith.constant 0 : index
    %17 = vector.load %arg7[%c0_15, %c0_16] : memref<1x128xf32, #tpu.memory_space<vmem>>, vector<1x128xf32>
    %18 = vector.broadcast %17 : vector<1x128xf32> to vector<16x128xf32>
    %19 = arith.addf %16, %18 : vector<16x128xf32>
    %20 = vector.shape_cast %9 : vector<16x128xf32> to vector<2x8x128xf32>
    %21 = arith.truncf %20 : vector<2x8x128xf32> to vector<2x8x128xbf16>
    %22 = vector.shape_cast %14 : vector<16x128xf32> to vector<2x8x128xf32>
    %23 = arith.truncf %22 : vector<2x8x128xf32> to vector<2x8x128xbf16>
    %24 = vector.shape_cast %19 : vector<16x128xf32> to vector<2x8x128xf32>
    %25 = arith.truncf %24 : vector<2x8x128xf32> to vector<2x8x128xbf16>
    %26 = vector.extract_strided_slice %21 {offsets = [0, 0, 0], sizes = [2, 8, 32], strides = [1, 1, 1]} : vector<2x8x128xbf16> to vector<2x8x32xbf16>
    %27 = vector.extract_strided_slice %23 {offsets = [0, 0, 0], sizes = [2, 8, 32], strides = [1, 1, 1]} : vector<2x8x128xbf16> to vector<2x8x32xbf16>
    %28 = vector.extract_strided_slice %25 {offsets = [0, 0, 0], sizes = [2, 8, 32], strides = [1, 1, 1]} : vector<2x8x128xbf16> to vector<2x8x32xbf16>
    "tpu.trace_start"() <{level = 10 : i32, message = "bqd,bkd->bqk"}> : () -> ()
    %cst_17 = arith.constant dense<0.000000e+00> : vector<2x8x8xf32>
    %29 = tpu.matmul %26, %27, %cst_17 {dimension_numbers = #tpu.dot_dimension_numbers<[2], [2], [1], [1], [0, 0, 0, 1, 1, 1], [0], [0]>} : vector<2x8x32xbf16>, vector<2x8x32xbf16>, vector<2x8x8xf32> -> vector<2x8x8xf32>
    "tpu.trace_stop"() : () -> ()
    %cst_18 = arith.constant dense<0xFF800000> : vector<2x8xf32>
    %30 = vector.multi_reduction <maximumf>, %29, %cst_18 [2] : vector<2x8x8xf32> to vector<2x8xf32>
    %31 = vector.shape_cast %30 : vector<2x8xf32> to vector<2x8x1xf32>
    %32 = vector.broadcast %31 : vector<2x8x1xf32> to vector<2x8x8xf32>
    %33 = arith.subf %29, %32 : vector<2x8x8xf32>
    %34 = math.exp %33 : vector<2x8x8xf32>
    %cst_19 = arith.constant dense<0.000000e+00> : vector<2x8xf32>
    %35 = vector.multi_reduction <add>, %34, %cst_19 [2] : vector<2x8x8xf32> to vector<2x8xf32>
    %36 = vector.shape_cast %35 : vector<2x8xf32> to vector<2x8x1xf32>
    %37 = tpu.reciprocal %36 {approx = true} : vector<2x8x1xf32> -> vector<2x8x1xf32>
    %38 = vector.broadcast %37 : vector<2x8x1xf32> to vector<2x8x8xf32>
    %39 = arith.mulf %34, %38 : vector<2x8x8xf32>
    %40 = arith.truncf %39 : vector<2x8x8xf32> to vector<2x8x8xbf16>
    "tpu.trace_start"() <{level = 10 : i32, message = "bqk,bkd->bqd"}> : () -> ()
    %cst_20 = arith.constant dense<0.000000e+00> : vector<2x8x32xf32>
    %41 = tpu.matmul %40, %28, %cst_20 {dimension_numbers = #tpu.dot_dimension_numbers<[2], [1], [1], [2], [0, 0, 0, 1, 1, 2], [0], [0]>} : vector<2x8x8xbf16>, vector<2x8x32xbf16>, vector<2x8x32xf32> -> vector<2x8x32xf32>
    "tpu.trace_stop"() : () -> ()
    %42 = vector.extract_strided_slice %21 {offsets = [0, 0, 32], sizes = [2, 8, 32], strides = [1, 1, 1]} : vector<2x8x128xbf16> to vector<2x8x32xbf16>
    %43 = vector.extract_strided_slice %23 {offsets = [0, 0, 32], sizes = [2, 8, 32], strides = [1, 1, 1]} : vector<2x8x128xbf16> to vector<2x8x32xbf16>
    %44 = vector.extract_strided_slice %25 {offsets = [0, 0, 32], sizes = [2, 8, 32], strides = [1, 1, 1]} : vector<2x8x128xbf16> to vector<2x8x32xbf16>
    "tpu.trace_start"() <{level = 10 : i32, message = "bqd,bkd->bqk"}> : () -> ()
    %cst_21 = arith.constant dense<0.000000e+00> : vector<2x8x8xf32>
    %45 = tpu.matmul %42, %43, %cst_21 {dimension_numbers = #tpu.dot_dimension_numbers<[2], [2], [1], [1], [0, 0, 0, 1, 1, 1], [0], [0]>} : vector<2x8x32xbf16>, vector<2x8x32xbf16>, vector<2x8x8xf32> -> vector<2x8x8xf32>
    "tpu.trace_stop"() : () -> ()
    %cst_22 = arith.constant dense<0xFF800000> : vector<2x8xf32>
    %46 = vector.multi_reduction <maximumf>, %45, %cst_22 [2] : vector<2x8x8xf32> to vector<2x8xf32>
    %47 = vector.shape_cast %46 : vector<2x8xf32> to vector<2x8x1xf32>
    %48 = vector.broadcast %47 : vector<2x8x1xf32> to vector<2x8x8xf32>
    %49 = arith.subf %45, %48 : vector<2x8x8xf32>
    %50 = math.exp %49 : vector<2x8x8xf32>
    %cst_23 = arith.constant dense<0.000000e+00> : vector<2x8xf32>
    %51 = vector.multi_reduction <add>, %50, %cst_23 [2] : vector<2x8x8xf32> to vector<2x8xf32>
    %52 = vector.shape_cast %51 : vector<2x8xf32> to vector<2x8x1xf32>
    %53 = tpu.reciprocal %52 {approx = true} : vector<2x8x1xf32> -> vector<2x8x1xf32>
    %54 = vector.broadcast %53 : vector<2x8x1xf32> to vector<2x8x8xf32>
    %55 = arith.mulf %50, %54 : vector<2x8x8xf32>
    %56 = arith.truncf %55 : vector<2x8x8xf32> to vector<2x8x8xbf16>
    "tpu.trace_start"() <{level = 10 : i32, message = "bqk,bkd->bqd"}> : () -> ()
    %cst_24 = arith.constant dense<0.000000e+00> : vector<2x8x32xf32>
    %57 = tpu.matmul %56, %44, %cst_24 {dimension_numbers = #tpu.dot_dimension_numbers<[2], [1], [1], [2], [0, 0, 0, 1, 1, 2], [0], [0]>} : vector<2x8x8xbf16>, vector<2x8x32xbf16>, vector<2x8x32xf32> -> vector<2x8x32xf32>
    "tpu.trace_stop"() : () -> ()
    %58 = vector.extract_strided_slice %21 {offsets = [0, 0, 64], sizes = [2, 8, 32], strides = [1, 1, 1]} : vector<2x8x128xbf16> to vector<2x8x32xbf16>
    %59 = vector.extract_strided_slice %23 {offsets = [0, 0, 64], sizes = [2, 8, 32], strides = [1, 1, 1]} : vector<2x8x128xbf16> to vector<2x8x32xbf16>
    %60 = vector.extract_strided_slice %25 {offsets = [0, 0, 64], sizes = [2, 8, 32], strides = [1, 1, 1]} : vector<2x8x128xbf16> to vector<2x8x32xbf16>
    "tpu.trace_start"() <{level = 10 : i32, message = "bqd,bkd->bqk"}> : () -> ()
    %cst_25 = arith.constant dense<0.000000e+00> : vector<2x8x8xf32>
    %61 = tpu.matmul %58, %59, %cst_25 {dimension_numbers = #tpu.dot_dimension_numbers<[2], [2], [1], [1], [0, 0, 0, 1, 1, 1], [0], [0]>} : vector<2x8x32xbf16>, vector<2x8x32xbf16>, vector<2x8x8xf32> -> vector<2x8x8xf32>
    "tpu.trace_stop"() : () -> ()
    %cst_26 = arith.constant dense<0xFF800000> : vector<2x8xf32>
    %62 = vector.multi_reduction <maximumf>, %61, %cst_26 [2] : vector<2x8x8xf32> to vector<2x8xf32>
    %63 = vector.shape_cast %62 : vector<2x8xf32> to vector<2x8x1xf32>
    %64 = vector.broadcast %63 : vector<2x8x1xf32> to vector<2x8x8xf32>
    %65 = arith.subf %61, %64 : vector<2x8x8xf32>
    %66 = math.exp %65 : vector<2x8x8xf32>
    %cst_27 = arith.constant dense<0.000000e+00> : vector<2x8xf32>
    %67 = vector.multi_reduction <add>, %66, %cst_27 [2] : vector<2x8x8xf32> to vector<2x8xf32>
    %68 = vector.shape_cast %67 : vector<2x8xf32> to vector<2x8x1xf32>
    %69 = tpu.reciprocal %68 {approx = true} : vector<2x8x1xf32> -> vector<2x8x1xf32>
    %70 = vector.broadcast %69 : vector<2x8x1xf32> to vector<2x8x8xf32>
    %71 = arith.mulf %66, %70 : vector<2x8x8xf32>
    %72 = arith.truncf %71 : vector<2x8x8xf32> to vector<2x8x8xbf16>
    "tpu.trace_start"() <{level = 10 : i32, message = "bqk,bkd->bqd"}> : () -> ()
    %cst_28 = arith.constant dense<0.000000e+00> : vector<2x8x32xf32>
    %73 = tpu.matmul %72, %60, %cst_28 {dimension_numbers = #tpu.dot_dimension_numbers<[2], [1], [1], [2], [0, 0, 0, 1, 1, 2], [0], [0]>} : vector<2x8x8xbf16>, vector<2x8x32xbf16>, vector<2x8x32xf32> -> vector<2x8x32xf32>
    "tpu.trace_stop"() : () -> ()
    %74 = vector.extract_strided_slice %21 {offsets = [0, 0, 96], sizes = [2, 8, 32], strides = [1, 1, 1]} : vector<2x8x128xbf16> to vector<2x8x32xbf16>
    %75 = vector.extract_strided_slice %23 {offsets = [0, 0, 96], sizes = [2, 8, 32], strides = [1, 1, 1]} : vector<2x8x128xbf16> to vector<2x8x32xbf16>
    %76 = vector.extract_strided_slice %25 {offsets = [0, 0, 96], sizes = [2, 8, 32], strides = [1, 1, 1]} : vector<2x8x128xbf16> to vector<2x8x32xbf16>
    "tpu.trace_start"() <{level = 10 : i32, message = "bqd,bkd->bqk"}> : () -> ()
    %cst_29 = arith.constant dense<0.000000e+00> : vector<2x8x8xf32>
    %77 = tpu.matmul %74, %75, %cst_29 {dimension_numbers = #tpu.dot_dimension_numbers<[2], [2], [1], [1], [0, 0, 0, 1, 1, 1], [0], [0]>} : vector<2x8x32xbf16>, vector<2x8x32xbf16>, vector<2x8x8xf32> -> vector<2x8x8xf32>
    "tpu.trace_stop"() : () -> ()
    %cst_30 = arith.constant dense<0xFF800000> : vector<2x8xf32>
    %78 = vector.multi_reduction <maximumf>, %77, %cst_30 [2] : vector<2x8x8xf32> to vector<2x8xf32>
    %79 = vector.shape_cast %78 : vector<2x8xf32> to vector<2x8x1xf32>
    %80 = vector.broadcast %79 : vector<2x8x1xf32> to vector<2x8x8xf32>
    %81 = arith.subf %77, %80 : vector<2x8x8xf32>
    %82 = math.exp %81 : vector<2x8x8xf32>
    %cst_31 = arith.constant dense<0.000000e+00> : vector<2x8xf32>
    %83 = vector.multi_reduction <add>, %82, %cst_31 [2] : vector<2x8x8xf32> to vector<2x8xf32>
    %84 = vector.shape_cast %83 : vector<2x8xf32> to vector<2x8x1xf32>
    %85 = tpu.reciprocal %84 {approx = true} : vector<2x8x1xf32> -> vector<2x8x1xf32>
    %86 = vector.broadcast %85 : vector<2x8x1xf32> to vector<2x8x8xf32>
    %87 = arith.mulf %82, %86 : vector<2x8x8xf32>
    %88 = arith.truncf %87 : vector<2x8x8xf32> to vector<2x8x8xbf16>
    "tpu.trace_start"() <{level = 10 : i32, message = "bqk,bkd->bqd"}> : () -> ()
    %cst_32 = arith.constant dense<0.000000e+00> : vector<2x8x32xf32>
    %89 = tpu.matmul %88, %76, %cst_32 {dimension_numbers = #tpu.dot_dimension_numbers<[2], [1], [1], [2], [0, 0, 0, 1, 1, 2], [0], [0]>} : vector<2x8x8xbf16>, vector<2x8x32xbf16>, vector<2x8x32xf32> -> vector<2x8x32xf32>
    "tpu.trace_stop"() : () -> ()
    %90 = tpu.concatenate %41, %57, %73, %89 in 2 : vector<2x8x32xf32>, vector<2x8x32xf32>, vector<2x8x32xf32>, vector<2x8x32xf32> -> vector<2x8x128xf32>
    %91 = vector.shape_cast %90 : vector<2x8x128xf32> to vector<16x128xf32>
    %92 = arith.truncf %91 : vector<16x128xf32> to vector<16x128xbf16>
    %c0_33 = arith.constant 0 : index
    %c0_34 = arith.constant 0 : index
    %93 = vector.load %arg8[%c0_33, %c0_34] : memref<128x128xbf16, #tpu.memory_space<vmem>>, vector<128x128xbf16>
    %cst_35 = arith.constant dense<0.000000e+00> : vector<16x128xf32>
    %94 = tpu.matmul %92, %93, %cst_35 {dimension_numbers = #tpu.dot_dimension_numbers<[1], [0], [0], [1], [0, 0, 1, 1], [], []>} : vector<16x128xbf16>, vector<128x128xbf16>, vector<16x128xf32> -> vector<16x128xf32>
    %c0_36 = arith.constant 0 : index
    %c0_37 = arith.constant 0 : index
    %95 = vector.load %arg9[%c0_36, %c0_37] : memref<1x128xf32, #tpu.memory_space<vmem>>, vector<1x128xf32>
    %96 = vector.broadcast %95 : vector<1x128xf32> to vector<16x128xf32>
    %97 = arith.addf %94, %96 : vector<16x128xf32>
    %98 = arith.addf %97, %1 : vector<16x128xf32>
    %cst_38 = arith.constant dense<0.000000e+00> : vector<16xf32>
    %99 = vector.multi_reduction <add>, %98, %cst_38 [1] : vector<16x128xf32> to vector<16xf32>
    %100 = vector.shape_cast %99 : vector<16xf32> to vector<16x1xf32>
    %cst_39 = arith.constant 1.280000e+02 : f32
    %101 = vector.broadcast %cst_39 : f32 to vector<16x1xf32>
    %102 = arith.divf %100, %101 : vector<16x1xf32>
    %103 = arith.mulf %98, %98 : vector<16x128xf32>
    %cst_40 = arith.constant dense<0.000000e+00> : vector<16xf32>
    %104 = vector.multi_reduction <add>, %103, %cst_40 [1] : vector<16x128xf32> to vector<16xf32>
    %105 = vector.shape_cast %104 : vector<16xf32> to vector<16x1xf32>
    %cst_41 = arith.constant 1.280000e+02 : f32
    %106 = vector.broadcast %cst_41 : f32 to vector<16x1xf32>
    %107 = arith.divf %105, %106 : vector<16x1xf32>
    %108 = arith.mulf %102, %102 : vector<16x1xf32>
    %109 = arith.subf %107, %108 : vector<16x1xf32>
    %110 = vector.broadcast %102 : vector<16x1xf32> to vector<16x128xf32>
    %111 = arith.subf %98, %110 : vector<16x128xf32>
    %cst_42 = arith.constant 9.99999974E-6 : f32
    %112 = vector.broadcast %cst_42 : f32 to vector<16x1xf32>
    %113 = arith.addf %109, %112 : vector<16x1xf32>
    %114 = math.rsqrt %113 : vector<16x1xf32>
    %115 = vector.broadcast %114 : vector<16x1xf32> to vector<16x128xf32>
    %116 = arith.mulf %111, %115 : vector<16x128xf32>
    %c0_43 = arith.constant 0 : index
    %c0_44 = arith.constant 0 : index
    %117 = vector.load %arg10[%c0_43, %c0_44] : memref<1x128xf32, #tpu.memory_space<vmem>>, vector<1x128xf32>
    %118 = vector.broadcast %117 : vector<1x128xf32> to vector<16x128xf32>
    %119 = arith.mulf %116, %118 : vector<16x128xf32>
    %c0_45 = arith.constant 0 : index
    %c0_46 = arith.constant 0 : index
    %120 = vector.load %arg11[%c0_45, %c0_46] : memref<1x128xf32, #tpu.memory_space<vmem>>, vector<1x128xf32>
    %121 = vector.broadcast %120 : vector<1x128xf32> to vector<16x128xf32>
    %122 = arith.addf %119, %121 : vector<16x128xf32>
    %123 = arith.truncf %122 : vector<16x128xf32> to vector<16x128xbf16>
    %c0_47 = arith.constant 0 : index
    %c0_48 = arith.constant 0 : index
    %124 = vector.load %arg12[%c0_47, %c0_48] : memref<128x256xbf16, #tpu.memory_space<vmem>>, vector<128x256xbf16>
    %cst_49 = arith.constant dense<0.000000e+00> : vector<16x256xf32>
    %125 = tpu.matmul %123, %124, %cst_49 {dimension_numbers = #tpu.dot_dimension_numbers<[1], [0], [0], [1], [0, 0, 1, 1], [], []>} : vector<16x128xbf16>, vector<128x256xbf16>, vector<16x256xf32> -> vector<16x256xf32>
    %c0_50 = arith.constant 0 : index
    %c0_51 = arith.constant 0 : index
    %126 = vector.load %arg13[%c0_50, %c0_51] : memref<1x256xf32, #tpu.memory_space<vmem>>, vector<1x256xf32>
    %127 = vector.broadcast %126 : vector<1x256xf32> to vector<16x256xf32>
    %128 = arith.addf %125, %127 : vector<16x256xf32>
    %cst_52 = arith.constant 0.000000e+00 : f32
    %129 = vector.broadcast %cst_52 : f32 to vector<16x256xf32>
    %130 = arith.maximumf %128, %129 : vector<16x256xf32>
    %131 = arith.truncf %130 : vector<16x256xf32> to vector<16x256xbf16>
    %c0_53 = arith.constant 0 : index
    %c0_54 = arith.constant 0 : index
    %132 = vector.load %arg14[%c0_53, %c0_54] : memref<256x128xbf16, #tpu.memory_space<vmem>>, vector<256x128xbf16>
    %cst_55 = arith.constant dense<0.000000e+00> : vector<16x128xf32>
    %133 = tpu.matmul %131, %132, %cst_55 {dimension_numbers = #tpu.dot_dimension_numbers<[1], [0], [0], [1], [0, 0, 1, 1], [], []>} : vector<16x256xbf16>, vector<256x128xbf16>, vector<16x128xf32> -> vector<16x128xf32>
    %c0_56 = arith.constant 0 : index
    %c0_57 = arith.constant 0 : index
    %134 = vector.load %arg15[%c0_56, %c0_57] : memref<1x128xf32, #tpu.memory_space<vmem>>, vector<1x128xf32>
    %135 = vector.broadcast %134 : vector<1x128xf32> to vector<16x128xf32>
    %136 = arith.addf %133, %135 : vector<16x128xf32>
    %137 = arith.addf %136, %122 : vector<16x128xf32>
    %cst_58 = arith.constant dense<0.000000e+00> : vector<16xf32>
    %138 = vector.multi_reduction <add>, %137, %cst_58 [1] : vector<16x128xf32> to vector<16xf32>
    %139 = vector.shape_cast %138 : vector<16xf32> to vector<16x1xf32>
    %cst_59 = arith.constant 1.280000e+02 : f32
    %140 = vector.broadcast %cst_59 : f32 to vector<16x1xf32>
    %141 = arith.divf %139, %140 : vector<16x1xf32>
    %142 = arith.mulf %137, %137 : vector<16x128xf32>
    %cst_60 = arith.constant dense<0.000000e+00> : vector<16xf32>
    %143 = vector.multi_reduction <add>, %142, %cst_60 [1] : vector<16x128xf32> to vector<16xf32>
    %144 = vector.shape_cast %143 : vector<16xf32> to vector<16x1xf32>
    %cst_61 = arith.constant 1.280000e+02 : f32
    %145 = vector.broadcast %cst_61 : f32 to vector<16x1xf32>
    %146 = arith.divf %144, %145 : vector<16x1xf32>
    %147 = arith.mulf %141, %141 : vector<16x1xf32>
    %148 = arith.subf %146, %147 : vector<16x1xf32>
    %149 = vector.broadcast %141 : vector<16x1xf32> to vector<16x128xf32>
    %150 = arith.subf %137, %149 : vector<16x128xf32>
    %cst_62 = arith.constant 9.99999974E-6 : f32
    %151 = vector.broadcast %cst_62 : f32 to vector<16x1xf32>
    %152 = arith.addf %148, %151 : vector<16x1xf32>
    %153 = math.rsqrt %152 : vector<16x1xf32>
    %154 = vector.broadcast %153 : vector<16x1xf32> to vector<16x128xf32>
    %155 = arith.mulf %150, %154 : vector<16x128xf32>
    %c0_63 = arith.constant 0 : index
    %c0_64 = arith.constant 0 : index
    %156 = vector.load %arg16[%c0_63, %c0_64] : memref<1x128xf32, #tpu.memory_space<vmem>>, vector<1x128xf32>
    %157 = vector.broadcast %156 : vector<1x128xf32> to vector<16x128xf32>
    %158 = arith.mulf %155, %157 : vector<16x128xf32>
    %c0_65 = arith.constant 0 : index
    %c0_66 = arith.constant 0 : index
    %159 = vector.load %arg17[%c0_65, %c0_66] : memref<1x128xf32, #tpu.memory_space<vmem>>, vector<1x128xf32>
    %160 = vector.broadcast %159 : vector<1x128xf32> to vector<16x128xf32>
    %161 = arith.addf %158, %160 : vector<16x128xf32>
    %162 = vector.shape_cast %161 : vector<16x128xf32> to vector<2x8x128xf32>
    %c0_67 = arith.constant 0 : index
    %c0_68 = arith.constant 0 : index
    %c0_69 = arith.constant 0 : index
    %163 = vector.load %arg18[%c0_67, %c0_68, %c0_69] : memref<2x8x128xf32, #tpu.memory_space<vmem>>, vector<2x8x128xf32>
    tpu.vector_store %arg18[%c0_67, %c0_68, %c0_69], %162 {strides = array<i32>} : memref<2x8x128xf32, #tpu.memory_space<vmem>>, vector<2x8x128xf32>,
    return
  }
  func.func @transform_0(%arg0: i32) -> (i32, i32, i32) {
    %c0_i32 = arith.constant 0 : i32
    %c0_i32_0 = arith.constant 0 : i32
    %c0_i32_1 = arith.constant 0 : i32
    return %arg0, %c0_i32, %c0_i32_0 : i32, i32, i32
  }
  func.func @transform_1(%arg0: i32) -> (i32, i32) {
    %c0_i32 = arith.constant 0 : i32
    %c0_i32_0 = arith.constant 0 : i32
    %c0_i32_1 = arith.constant 0 : i32
    return %c0_i32, %c0_i32_0 : i32, i32
  }
  func.func @transform_2(%arg0: i32) -> (i32, i32) {
    %c0_i32 = arith.constant 0 : i32
    %c0_i32_0 = arith.constant 0 : i32
    %c0_i32_1 = arith.constant 0 : i32
    return %c0_i32, %c0_i32_0 : i32, i32
  }
  func.func @transform_3(%arg0: i32) -> (i32, i32) {
    %c0_i32 = arith.constant 0 : i32
    %c0_i32_0 = arith.constant 0 : i32
    %c0_i32_1 = arith.constant 0 : i32
    return %c0_i32, %c0_i32_0 : i32, i32
  }
  func.func @transform_4(%arg0: i32) -> (i32, i32) {
    %c0_i32 = arith.constant 0 : i32
    %c0_i32_0 = arith.constant 0 : i32
    %c0_i32_1 = arith.constant 0 : i32
    return %c0_i32, %c0_i32_0 : i32, i32
  }
  func.func @transform_5(%arg0: i32) -> (i32, i32) {
    %c0_i32 = arith.constant 0 : i32
    %c0_i32_0 = arith.constant 0 : i32
    %c0_i32_1 = arith.constant 0 : i32
    return %c0_i32, %c0_i32_0 : i32, i32
  }
  func.func @transform_6(%arg0: i32) -> (i32, i32) {
    %c0_i32 = arith.constant 0 : i32
    %c0_i32_0 = arith.constant 0 : i32
    %c0_i32_1 = arith.constant 0 : i32
    return %c0_i32, %c0_i32_0 : i32, i32
  }
  func.func @transform_7(%arg0: i32) -> (i32, i32) {
    %c0_i32 = arith.constant 0 : i32
    %c0_i32_0 = arith.constant 0 : i32
    %c0_i32_1 = arith.constant 0 : i32
    return %c0_i32, %c0_i32_0 : i32, i32
  }
  func.func @transform_8(%arg0: i32) -> (i32, i32) {
    %c0_i32 = arith.constant 0 : i32
    %c0_i32_0 = arith.constant 0 : i32
    %c0_i32_1 = arith.constant 0 : i32
    return %c0_i32, %c0_i32_0 : i32, i32
  }
  func.func @transform_9(%arg0: i32) -> (i32, i32) {
    %c0_i32 = arith.constant 0 : i32
    %c0_i32_0 = arith.constant 0 : i32
    %c0_i32_1 = arith.constant 0 : i32
    return %c0_i32, %c0_i32_0 : i32, i32
  }
  func.func @transform_10(%arg0: i32) -> (i32, i32) {
    %c0_i32 = arith.constant 0 : i32
    %c0_i32_0 = arith.constant 0 : i32
    %c0_i32_1 = arith.constant 0 : i32
    return %c0_i32, %c0_i32_0 : i32, i32
  }
  func.func @transform_11(%arg0: i32) -> (i32, i32) {
    %c0_i32 = arith.constant 0 : i32
    %c0_i32_0 = arith.constant 0 : i32
    %c0_i32_1 = arith.constant 0 : i32
    return %c0_i32, %c0_i32_0 : i32, i32
  }
  func.func @transform_12(%arg0: i32) -> (i32, i32) {
    %c0_i32 = arith.constant 0 : i32
    %c0_i32_0 = arith.constant 0 : i32
    %c0_i32_1 = arith.constant 0 : i32
    return %c0_i32, %c0_i32_0 : i32, i32
  }
  func.func @transform_13(%arg0: i32) -> (i32, i32) {
    %c0_i32 = arith.constant 0 : i32
    %c0_i32_0 = arith.constant 0 : i32
    %c0_i32_1 = arith.constant 0 : i32
    return %c0_i32, %c0_i32_0 : i32, i32
  }
  func.func @transform_14(%arg0: i32) -> (i32, i32) {
    %c0_i32 = arith.constant 0 : i32
    %c0_i32_0 = arith.constant 0 : i32
    %c0_i32_1 = arith.constant 0 : i32
    return %c0_i32, %c0_i32_0 : i32, i32
  }
  func.func @transform_15(%arg0: i32) -> (i32, i32) {
    %c0_i32 = arith.constant 0 : i32
    %c0_i32_0 = arith.constant 0 : i32
    %c0_i32_1 = arith.constant 0 : i32
    return %c0_i32, %c0_i32_0 : i32, i32
  }
  func.func @transform_16(%arg0: i32) -> (i32, i32) {
    %c0_i32 = arith.constant 0 : i32
    %c0_i32_0 = arith.constant 0 : i32
    %c0_i32_1 = arith.constant 0 : i32
    return %c0_i32, %c0_i32_0 : i32, i32
  }
  func.func @transform_17(%arg0: i32) -> (i32, i32, i32) {
    %c0_i32 = arith.constant 0 : i32
    %c0_i32_0 = arith.constant 0 : i32
    %c0_i32_1 = arith.constant 0 : i32
    return %arg0, %c0_i32, %c0_i32_0 : i32, i32, i32
  }
}

</mosaic_0001>

<bundles_post_ra>
// kernel: tpu_custom_call.1
= control target key start
LH: loop header
LB: loop body
LE: loop exit
PB: predicated region body
PF: predicated region fallthrough
CT: control target
= control target key end

     0   :  { %s3060_s0 = inlined_call_operand.hbm [shape: f32[2,8,128], index: 0, kind: input, shape index: {}]   ;;  %s3061_s1 = inlined_call_operand.hbm [shape: bf16[128,128], index: 1, kind: input, shape index: {}]   ;;  %s3062_s2 = inlined_call_operand.vmem [shape: f32[1,128], index: 2, kind: input, shape index: {}]   ;;  %s3063_s3 = inlined_call_operand.hbm [shape: bf16[128,128], index: 3, kind: input, shape index: {}]   ;;  %s3064_s4 = inlined_call_operand.vmem [shape: f32[1,128], index: 4, kind: input, shape index: {}]   ;;  %s3065_s5 = inlined_call_operand.hbm [shape: bf16[128,128], index: 5, kind: input, shape index: {}]   ;;  %s3066_s6 = inlined_call_operand.vmem [shape: f32[1,128], index: 6, kind: input, shape index: {}]   ;;  %s3067_s7 = inlined_call_operand.hbm [shape: bf16[128,128], index: 7, kind: input, shape index: {}]   ;;  %s3068_s8 = inlined_call_operand.vmem [shape: f32[1,128], index: 8, kind: input, shape index: {}]   ;;  %s3069_s9 = inlined_call_operand.vmem [shape: f32[1,128], index: 9, kind: input, shape index: {}]   ;;  %s3070_s10 = inlined_call_operand.vmem [shape: f32[1,128], index: 10, kind: input, shape index: {}]   ;;  %s3071_s11 = inlined_call_operand.hbm [shape: bf16[128,256], index: 11, kind: input, shape index: {}]   ;;  %s3072_s12 = inlined_call_operand.vmem [shape: f32[1,256], index: 12, kind: input, shape index: {}]   ;;  %s3073_s13 = inlined_call_operand.hbm [shape: bf16[256,128], index: 13, kind: input, shape index: {}]   ;;  %s3074_s14 = inlined_call_operand.vmem [shape: f32[1,128], index: 14, kind: input, shape index: {}]   ;;  %s3075_s15 = inlined_call_operand.vmem [shape: f32[1,128], index: 15, kind: input, shape index: {}]   ;;  %s3076_s16 = inlined_call_operand.vmem [shape: f32[1,128], index: 16, kind: input, shape index: {}]   ;;  %s3077_s17 = inlined_call_operand.hbm [shape: f32[2,8,128], index: 17, kind: output, shape index: {}]  }
   0x1   :  { %3078 = sst [smem:[#allocation20_spill]] %s3060_s0 }
   0x2   :  { %3079 = sst [smem:[#allocation21_spill]] %s3061_s1 }
   0x3   :  { %22 = vsyncpa [#allocation3], 0 }
   0x4   :  { %23 = vsyncpa [#allocation6], 0 }
   0x5   :  { %24 = vsyncpa [#allocation9], 0 }
   0x6   :  { %25 = vsyncpa [#allocation12], 0 }
   0x7   :  { %26 = vsyncpa [#allocation4], 0  ;;  %s2640_s24 = smov [#allocation5]  }
   0x8   :  { %s44_s25 = sshll.u32 %s2640_s24, 4  ;;  %s45_s25 = int_to_ptr.vmem [resolvable:$true] %s44_s25 }
   0x9   :  { %s2478_s26 = scalar_lea.vmem %s45_s25, 1024  ;;  %p2483_p1 = scmp.lt.s32.totalorder %s45_s25, %s45_s25 }
   0xa   :  { %p2479_p0 = scmp.ne.s32.totalorder %s45_s25, %s2478_s26  ;;  %p2484_p2 = scmp.lt.s32.totalorder %s2478_s26, %s2478_s26 }
   0xc   :  { %p2485_p3 = por %p2484_p2, %p2483_p1 }
   0xe   :  { %p2486_p4 = pnand %p2485_p3, %p2479_p0 }
  0x10   :  { %2489 = shalt.err (!%p2486_p4)
}
  0x11   :  { %s2641_s27 = smov 64   ;;  %s2642_s28 = smov 4  }
  0x12   :  { %s3080_s30 = sld [smem:[#allocation21_spill]]  ;;  %s2643_s18 = smov [#allocation8]  }
  0x13   :  { %s72_s19 = sshll.u32 %s2643_s18, 4  ;;  %s73_s19 = int_to_ptr.vmem [resolvable:$true] %s72_s19 }
  0x14   :  { %s2498_s1 = scalar_lea.vmem %s73_s19, 1024  ;;  %p2503_p6 = scmp.lt.s32.totalorder %s73_s19, %s73_s19 }
  0x15   :  { %p2499_p5 = scmp.ne.s32.totalorder %s73_s19, %s2498_s1  ;;  %p2504_p7 = scmp.lt.s32.totalorder %s2498_s1, %s2498_s1 }
  0x17   :  { %p2505_p8 = por %p2504_p7, %p2503_p6 }
  0x18   :  { %50 = dma.hbm_to_vmem [thread:$0]  %s3080_s30, 1024, %s45_s25, [#allocation6], %s2641_s27, %s2641_s27, %s2642_s28  }
  0x19   :  { %p2506_p9 = pnand %p2505_p8, %p2499_p5 }
  0x1b   :  { %2509 = shalt.err (!%p2506_p9)
}
  0x1c   :  { %78 = dma.hbm_to_vmem [thread:$0]  %s3065_s5, 1024, %s73_s19, [#allocation9], %s2641_s27, %s2641_s27, %s2642_s28  }
  0x1d   :  { %s2644_s22 = smov [#allocation11]   ;;  %s2645_s24 = smov [#allocation2]  }
  0x1e   :  { %s104_s23 = sshll.u32 %s2644_s22, 4  ;;  %s32_s25 = sshll.u32 %s2645_s24, 4  ;;  %s105_s23 = int_to_ptr.vmem [resolvable:$true] %s104_s23  ;;  %s33_s25 = int_to_ptr.vmem [resolvable:$true] %s32_s25 }
  0x1f   :  { %s2518_s26 = scalar_lea.vmem %s105_s23, 2048  ;;  %p2523_p11 = scmp.lt.s32.totalorder %s105_s23, %s105_s23 }
  0x20   :  { %p2519_p10 = scmp.ne.s32.totalorder %s105_s23, %s2518_s26  ;;  %p2524_p12 = scmp.lt.s32.totalorder %s2518_s26, %s2518_s26 }
  0x22   :  { %p2525_p13 = por %p2524_p12, %p2523_p11 }
  0x24   :  { %p2526_p0 = pnand %p2525_p13, %p2519_p10 }
  0x26   :  { %2529 = shalt.err (!%p2526_p0)
}
  0x27   :  { %s2646_s29 = smov 128   ;;  %s2647_s0 = smov 8  }
  0x28   :  { %110 = dma.hbm_to_vmem [thread:$0]  %s3071_s11, 2048, %s105_s23, [#allocation12], %s2646_s29, %s2646_s29, %s2647_s0  }
  0x29   :  { %s2538_s18 = scalar_lea.vmem %s33_s25, 256  ;;  %p2543_p2 = scmp.lt.s32.totalorder %s33_s25, %s33_s25 }
  0x2a   :  { %p2539_p1 = scmp.ne.s32.totalorder %s33_s25, %s2538_s18  ;;  %p2544_p3 = scmp.lt.s32.totalorder %s2538_s18, %s2538_s18 }
  0x2c   :  { %p2545_p4 = por %p2544_p3, %p2543_p2 }
  0x2e   :  { %p2546_p5 = pnand %p2545_p4, %p2539_p1 }
  0x30   :  { %2549 = shalt.err (!%p2546_p5)
}
  0x31   :  { %s3081_s20 = sld [smem:[#allocation20_spill]]  ;;  %s2648_s21 = smov [#allocation7]  }
  0x32   :  { %s58_s22 = sshll.u32 %s2648_s21, 4  ;;  %s2649_s24 = smov [#allocation10]   ;;  %s59_s22 = int_to_ptr.vmem [resolvable:$true] %s58_s22 }
  0x33   :  { %s86_s26 = sshll.u32 %s2649_s24, 4  ;;  %s2558_s11 = scalar_lea.vmem %s59_s22, 1024  ;;  %s87_s26 = int_to_ptr.vmem [resolvable:$true] %s86_s26 }
  0x34   :  { %p2559_p6 = scmp.ne.s32.totalorder %s59_s22, %s2558_s11  ;;  %p2563_p7 = scmp.lt.s32.totalorder %s59_s22, %s59_s22 }
  0x35   :  { %p2564_p8 = scmp.lt.s32.totalorder %s2558_s11, %s2558_s11 }
  0x37   :  { %38 = dma.hbm_to_vmem [thread:$0]  %s3081_s20, 256, %s33_s25, [#allocation3], %s2646_s29, %s2646_s29, %s2647_s0  }
  0x38   :  { %p2565_p9 = por %p2564_p8, %p2563_p7 }
  0x3a   :  { %p2566_p10 = pnand %p2565_p9, %p2559_p6 }
  0x3c   :  { %2569 = shalt.err (!%p2566_p10)
}
  0x3d   :  { %64 = dma.hbm_to_vmem [thread:$0]  %s3063_s3, 1024, %s59_s22, [#allocation6], %s2641_s27, %s2641_s27, %s2642_s28  }
  0x3e   :  { %s2578_s25 = scalar_lea.vmem %s87_s26, 1024  ;;  %p2583_p12 = scmp.lt.s32.totalorder %s87_s26, %s87_s26 }
  0x3f   :  { %p2579_p11 = scmp.ne.s32.totalorder %s87_s26, %s2578_s25  ;;  %p2584_p13 = scmp.lt.s32.totalorder %s2578_s25, %s2578_s25 }
  0x41   :  { %p2585_p0 = por %p2584_p13, %p2583_p12 }
  0x43   :  { %p2586_p1 = pnand %p2585_p0, %p2579_p11 }
  0x45   :  { %2589 = shalt.err (!%p2586_p1)
}
  0x46   :  { %92 = dma.hbm_to_vmem [thread:$0]  %s3067_s7, 1024, %s87_s26, [#allocation9], %s2641_s27, %s2641_s27, %s2642_s28  }
  0x47   :  { %s2650_s19 = smov [#allocation13]  }
  0x48   :  { %s118_s1 = sshll.u32 %s2650_s19, 4  ;;  %s119_s1 = int_to_ptr.vmem [resolvable:$true] %s118_s1 }
  0x49   :  { %s2598_s20 = scalar_lea.vmem %s119_s1, 2048  ;;  %p2603_p3 = scmp.lt.s32.totalorder %s119_s1, %s119_s1 }
  0x4a   :  { %p2599_p2 = scmp.ne.s32.totalorder %s119_s1, %s2598_s20  ;;  %p2604_p4 = scmp.lt.s32.totalorder %s2598_s20, %s2598_s20 }
  0x4c   :  { %p2605_p5 = por %p2604_p4, %p2603_p3 }
  0x4e   :  { %p2606_p6 = pnand %p2605_p5, %p2599_p2 }
  0x50   :  { %2609 = shalt.err (!%p2606_p6)
}
  0x51   :  { %124 = dma.hbm_to_vmem [thread:$0]  %s3073_s13, 2048, %s119_s1, [#allocation12], %s2641_s27, %s2641_s27, %s2642_s28  }
  0x52   :  { %2630 = dma.done.wait [#allocation3], 256  }
  0x53   :  { %2631 = vsyncadd [#allocation3], 4294967040 }
  0x54   :  { %2632 = dma.done.wait [#allocation6], 2048  }
  0x55   :  { %2633 = vsyncadd [#allocation6], 4294965248 }
  0x56   :  { %2634 = dma.done.wait [#allocation9], 2048  }
  0x57   :  { %2635 = vsyncadd [#allocation9], 4294965248 }
  0x58   :  { %2636 = dma.done.wait [#allocation12], 4096  }
  0x59   :  { %2637 = vsyncadd [#allocation12], 4294963200  ;;  %v2651_v0 = vmov 0.0   ;;  %vm2652_vm0 = vmmov 0   ;;  %v2358_v1 = vld [vmem:[#allocation5 + $0x38] sm:$0xff]   ;;  %v2360_v3 = vld [vmem:[#allocation5 + $0x30] sm:$0xff]  }
  0x5a   :  { %2150 = vmatprep.subr.bf16.mxu0 %v2651_v0  ;;  %2170 = vmatprep.subr.bf16.mxu1 %v2651_v0  ;;  %v2359_v2 = vld [vmem:[#allocation7 + $0x38] sm:$0xff]   ;;  %v2361_v4 = vld [vmem:[#allocation7 + $0x30] sm:$0xff]   ;;  %v2362_v5 = vld [vmem:[#allocation5 + $0x28] sm:$0xff]   ;;  %vm500_vm1 = vcmask 261120   ;;  %vm593_vm2 = vcmask 64512   ;;  %vm621_vm3 = vcmask 1043456  }
  0x5b   :  { %2166 = vmatprep.mubr.msk.bf16.mxu0 %vm2652_vm0, %v2651_v0  ;;  %2186 = vmatprep.mubr.msk.bf16.mxu1 %vm2652_vm0, %v2651_v0  ;;  %v2363_v6 = vld [vmem:[#allocation7 + $0x28] sm:$0xff]   ;;  %v2364_v7 = vld [vmem:[#allocation5 + $0x20] sm:$0xff]   ;;  %v2366_v9 = vld [vmem:[#allocation5 + $0x18] sm:$0xff]   ;;  %vm1403_vm4 = vcmask 523264   ;;  %vm1406_vm5 = vcmask 785408   ;;  %s2656_s1 = smov [#allocation14]  }
  0x5c   :  { %2151 = vmatpush3.bf16.msra.mxu0 %v2358_v1  ;;  %2171 = vmatpush3.bf16.msra.mxu1 %v2359_v2  ;;  %v2365_v8 = vld [vmem:[#allocation7 + $0x20] sm:$0xff]   ;;  %v2367_v10 = vld [vmem:[#allocation7 + $0x18] sm:$0xff]   ;;  %v2368_v11 = vld [vmem:[#allocation5 + $0x10] sm:$0xff]   ;;  %s1956_s20 = sshll.u32 %s2656_s1, 4  ;;  %s1957_s20 = int_to_ptr.vmem [resolvable:$true] %s1956_s20 }
  0x5d   :  { %2152 = vmatprep.subr.bf16.mxu0 %v2651_v0  ;;  %2172 = vmatprep.subr.bf16.mxu1 %v2651_v0  ;;  %v2369_v12 = vld [vmem:[#allocation7 + $0x10] sm:$0xff]   ;;  %v2370_v13 = vld [vmem:[#allocation5 + $0x8] sm:$0xff]   ;;  %v2372_v15 = vld [vmem:[#allocation5] sm:$0xff]   ;;  %s2610_s3 = scalar_lea.vmem %s1957_s20, 256  ;;  %p2615_p8 = scmp.lt.s32.totalorder %s1957_s20, %s1957_s20 }
  0x5e   :  { %v2371_v14 = vld [vmem:[#allocation7 + $0x8] sm:$0xff]   ;;  %v2807_v16 = vld [vmem:[#allocation2] sm:$0xff]  ;;  %v2809_v17 = vld [vmem:[#allocation2 + $0x8] sm:$0xff]  ;;  %p2611_p7 = scmp.ne.s32.totalorder %s1957_s20, %s2610_s3  ;;  %p2616_p9 = scmp.lt.s32.totalorder %s2610_s3, %s2610_s3 }
  0x5f   :  { %v2373_v18 = vld [vmem:[#allocation7] sm:$0xff]   ;;  %v2815_v19 = vpack.c.bf16 %v2809_v17, %v2807_v16  ;;  %v1971_v20 = vld [vmem:[%s3062_s2] ss:$0 sm:$0xff]  ;;  %v2374_v42 = vld [vmem:[#allocation8 + $0x38] sm:$0xff]   ;;  %s2653_s2 = smov 96  }
  0x60   :  { %2153 = vmatpush3.bf16.msra.mxu0 %v2360_v3  ;;  %2173 = vmatpush3.bf16.msra.mxu1 %v2361_v4  ;;  %v1980_v21 = vld [vmem:[%s3064_s4] ss:$0 sm:$0xff]  ;;  %v2376_v44 = vld [vmem:[#allocation8 + $0x28] sm:$0xff]   ;;  %v2377_v45 = vld [vmem:[#allocation8 + $0x20] sm:$0xff]   ;;  %p2617_p10 = por %p2616_p9, %p2615_p8 }
  0x61   :  { %2154 = vmatprep.subr.bf16.mxu0 %v2651_v0  ;;  %2174 = vmatprep.subr.bf16.mxu1 %v2651_v0  ;;  %v2375_v43 = vld [vmem:[#allocation8 + $0x30] sm:$0xff]   ;;  %v2378_v46 = vld [vmem:[#allocation8 + $0x18] sm:$0xff]   ;;  %v2380_v48 = vld [vmem:[#allocation8 + $0x8] sm:$0xff]  }
  0x62   :  { %v2379_v47 = vld [vmem:[#allocation8 + $0x10] sm:$0xff]   ;;  %v2381_v49 = vld [vmem:[#allocation8] sm:$0xff]   ;;  %p2618_p11 = pnand %p2617_p10, %p2611_p7 }
  0x64   :  { %2155 = vmatpush3.bf16.msra.mxu0 %v2362_v5  ;;  %2175 = vmatpush3.bf16.msra.mxu1 %v2363_v6 }
  0x65   :  { %2156 = vmatprep.subr.bf16.mxu0 %v2651_v0  ;;  %2176 = vmatprep.subr.bf16.mxu1 %v2651_v0 }
  0x68   :  { %2157 = vmatpush3.bf16.msra.mxu0 %v2364_v7  ;;  %2177 = vmatpush3.bf16.msra.mxu1 %v2365_v8  ;;  %v1989_v8 = vld [vmem:[%s3066_s6] ss:$0 sm:$0xff]  ;;  %s2654_s6 = smov 32  }
  0x69   :  { %2158 = vmatprep.subr.bf16.mxu0 %v2651_v0  ;;  %2178 = vmatprep.subr.bf16.mxu1 %v2651_v0 }
  0x6c   :  { %2159 = vmatpush3.bf16.msra.mxu0 %v2366_v9  ;;  %2179 = vmatpush3.bf16.msra.mxu1 %v2367_v10 }
  0x6d   :  { %2160 = vmatprep.subr.bf16.mxu0 %v2651_v0  ;;  %2180 = vmatprep.subr.bf16.mxu1 %v2651_v0 }
  0x70   :  { %2161 = vmatpush3.bf16.msra.mxu0 %v2368_v11  ;;  %2181 = vmatpush3.bf16.msra.mxu1 %v2369_v12 }
  0x71   :  { %2162 = vmatprep.subr.bf16.mxu0 %v2651_v0  ;;  %2182 = vmatprep.subr.bf16.mxu1 %v2651_v0 }
  0x74   :  { %2163 = vmatpush3.bf16.msra.mxu0 %v2370_v13  ;;  %2183 = vmatpush3.bf16.msra.mxu1 %v2371_v14 }
  0x75   :  { %2164 = vmatprep.subr.bf16.mxu0 %v2651_v0  ;;  %2184 = vmatprep.subr.bf16.mxu1 %v2651_v0 }
  0x78   :  { %2165 = vmatpush3.bf16.msra.mxu0 %v2372_v15  ;;  %2185 = vmatpush3.bf16.msra.mxu1 %v2373_v18 }
  0x79   :  { %2190 = vmatprep.subr.bf16.mxu0 %v2651_v0  ;;  %2210 = vmatprep.subr.bf16.mxu1 %v2651_v0 }
  0x7b   :  { %2167 = vmatmul.mubr.bf16.vlgmr.msra.gmra.mxu0 %v2815_v19  ;;  %2187 = vmatmul.mubr.bf16.vlgmr.msra.gmra.mxu1 %v2815_v19 }
  0x7c   :  { %2206 = vmatprep.mubr.msk.bf16.mxu0 %vm2652_vm0, %v2651_v0  ;;  %2212 = vmatprep.mubr.msk.bf16.mxu1 %vm2652_vm0, %v2651_v0 }
  0x7d   :  { %2191 = vmatpush3.bf16.msra.mxu0 %v2374_v42 }
  0x7e   :  { %2192 = vmatprep.subr.bf16.mxu0 %v2651_v0 }
  0x81   :  { %2193 = vmatpush3.bf16.msra.mxu0 %v2375_v43 }
  0x82   :  { %2194 = vmatprep.subr.bf16.mxu0 %v2651_v0 }
  0x85   :  { %2195 = vmatpush3.bf16.msra.mxu0 %v2376_v44 }
  0x86   :  { %2196 = vmatprep.subr.bf16.mxu0 %v2651_v0 }
  0x89   :  { %2197 = vmatpush3.bf16.msra.mxu0 %v2377_v45 }
  0x8a   :  { %2198 = vmatprep.subr.bf16.mxu0 %v2651_v0 }
  0x8d   :  { %2199 = vmatpush3.bf16.msra.mxu0 %v2378_v46 }
  0x8e   :  { %2200 = vmatprep.subr.bf16.mxu0 %v2651_v0 }
  0x91   :  { %2201 = vmatpush3.bf16.msra.mxu0 %v2379_v47 }
  0x92   :  { %2202 = vmatprep.subr.bf16.mxu0 %v2651_v0 }
  0x95   :  { %2203 = vmatpush3.bf16.msra.mxu0 %v2380_v48 }
  0x96   :  { %2204 = vmatprep.subr.bf16.mxu0 %v2651_v0 }
  0x99   :  { %2205 = vmatpush3.bf16.msra.mxu0 %v2381_v49 }
  0x9a   :  { %2258 = vmatprep.subr.bf16.mxu0 %v2651_v0 }
  0x9c   :  { %2207 = vmatmul.mubr.bf16.vlgmr.msra.gmra.mxu0 %v2815_v19 }
  0x9d   :  { %2260 = vmatprep.mubr.msk.bf16.mxu0 %vm2652_vm0, %v2651_v0 }
 0x13b   :  { %v261_v22 = vpop.f32.mrf.mxu0  ;;  %v375_v23 = vpop.f32.mrf.mxu1 }
 0x13c   :  { %v262_v24 = vadd.f32 %v1971_v20, %v261_v22  ;;  %v376_v25 = vadd.f32 %v1980_v21, %v375_v23 }
 0x13d   :  { %v2168_v26 = vpop.f32.mrf.mxu0  ;;  %v2188_v27 = vpop.f32.mrf.mxu1 }
 0x13e   :  { %v2831_v28 = vpack.c.bf16 %v376_v25, %v376_v25  ;;  %v268_v31 = vmul.f32 0.17677669, %v262_v24 }
 0x13f   :  { %v264_v29 = vpop.f32.mrf.mxu0  ;;  %v378_v30 = vpop.f32.mrf.mxu1 }
 0x140   :  { %v379_v32 = vadd.f32 %v1980_v21, %v378_v30  ;;  %v505_v34 = vsel %vm500_vm1, %v2831_v28, 0  ;;  %v2836_v36 = vpack.c.bf16 %v268_v31, %v268_v31  ;;  %v265_v38 = vadd.f32 %v1971_v20, %v264_v29 }
 0x141   :  { %v2169_v33 = vpop.f32.mrf.mxu0  ;;  %v2189_v35 = vpop.f32.mrf.mxu1  ;;  %2211 = vmatpush3.bf16.xpose.msra.mxu1 %v505_v34 }
 0x142   :  { %2216 = vmatprep.subr.bf16.mxu1 %v2651_v0  ;;  %v2838_v37 = vpack.c.bf16 %v379_v32, %v379_v32  ;;  %v269_v40 = vmul.f32 0.17677669, %v265_v38 }
 0x144   :  { %v551_v39 = vsel %vm500_vm1, %v2838_v37, 0  ;;  %v2847_v41 = vpack.c.bf16 %v269_v40, %v269_v40 }
 0x148   :  { %2213 = vmatmul.mubr.msk.bf16.vlgmr.msra.gmra.mxu1 %vm500_vm1, %v2836_v36 }
 0x149   :  { %2217 = vmatpush3.bf16.xpose.msra.mxu1 %v551_v39  ;;  %2218 = vmatprep.mubr.msk.bf16.mxu1 %vm2652_vm0, %v2651_v0 }
 0x14a   :  { %2222 = vmatprep.subr.bf16.mxu1 %v2651_v0 }
 0x150   :  { %2219 = vmatmul.mubr.msk.bf16.vlgmr.msra.gmra.mxu1 %vm500_vm1, %v2847_v41 }
 0x151   :  { %2224 = vmatprep.mubr.msk.bf16.mxu1 %vm2652_vm0, %v2651_v0 }
 0x15c   :  { %v487_v7 = vpop.f32.mrf.mxu0 }
 0x15d   :  { %v488_v10 = vadd.f32 %v1989_v8, %v487_v7 }
 0x15e   :  { %v2208_v9 = vpop.f32.mrf.mxu0 }
 0x15f   :  { %v2873_v14 = vpack.c.bf16 %v488_v10, %v488_v10 }
 0x160   :  { %v490_v11 = vpop.f32.mrf.mxu0 }
 0x161   :  { %v491_v12 = vadd.f32 %v1989_v8, %v490_v11  ;;  %v623_v15 = vsel %vm621_vm3, %v2873_v14, 0 }
 0x162   :  { %v2209_v13 = vpop.f32.mrf.mxu0  ;;  %2223 = vmatpush3.bf16.msra.mxu1 %v623_v15 }
 0x163   :  { %2228 = vmatprep.subr.bf16.mxu1 %v2651_v0  ;;  %v2884_v21 = vpack.c.bf16 %v491_v12, %v491_v12 }
 0x165   :  { %v669_v24 = vsel %vm621_vm3, %v2884_v21, 0 }
 0x208   :  { %v541_v50 = vpop.f32.mrf.mxu1 }
 0x209   :  { %v594_v51 = vsel %vm593_vm2, %v541_v50, -inf }
 0x20a   :  { %595 = vmax.xlane.f32.xlu0 %v594_v51  ;;  %v2214_v52 = vpop.f32.mrf.mxu1 }
 0x20c   :  { %v544_v53 = vpop.f32.mrf.mxu1 }
 0x20e   :  { %v2215_v54 = vpop.f32.mrf.mxu1 }
 0x210   :  { %v587_v55 = vpop.f32.mrf.mxu1 }
 0x211   :  { %v597_v56 = vsel %vm593_vm2, %v587_v55, -inf }
 0x212   :  { %598 = vmax.xlane.f32.xlu0 %v597_v56  ;;  %v2220_v57 = vpop.f32.mrf.mxu1 }
 0x214   :  { %v590_v58 = vpop.f32.mrf.mxu1 }
 0x216   :  { %v2221_v59 = vpop.f32.mrf.mxu1 }
 0x228   :  { %715 = vrot.lane.b32.xlu0 %v2831_v28, %s2653_s2 }
 0x293   :  { %v596_v60 = vpop.xlane.xlu0 %595 }
 0x294   :  { %v600_v61 = vsub.f32 %v541_v50, %v596_v60 }
 0x296   :  { %v602_v62 = vmul.f32 1.442695, %v600_v61 }
 0x298   :  { %2430 = vpow2.f32 %v602_v62 }
 0x29b   :  { %v599_v63 = vpop.xlane.xlu0 %598 }
 0x29c   :  { %v601_v1 = vsub.f32 %v587_v55, %v599_v63 }
 0x29e   :  { %v604_v2 = vmul.f32 1.442695, %v601_v1 }
 0x29f   :  { %v716_v27 = vpop.permute.xlu0 %715 }
 0x2a0   :  { %2432 = vpow2.f32 %v604_v2  ;;  %v721_v31 = vsel %vm500_vm1, %v716_v27, 0 }
 0x2a5   :  { %v2431_v3 = vpop.eup %2430 }
 0x2a6   :  { %v606_v4 = vsel %vm593_vm2, %v2431_v3, 0.0 }
 0x2a7   :  { %607 = vadd.xlane.f32.xlu1 %v606_v4 }
 0x2ad   :  { %v2433_v5 = vpop.eup %2432 }
 0x2ae   :  { %v609_v6 = vsel %vm593_vm2, %v2433_v5, 0.0 }
 0x2af   :  { %610 = vadd.xlane.f32.xlu1 %v609_v6 }
 0x2c0   :  { %712 = vrot.lane.b32.xlu1 %v2836_v36, %s2653_s2 }
 0x2c4   :  { %767 = vrot.lane.b32.xlu1 %v2838_v37, %s2653_s2 }
 0x2c8   :  { %764 = vrot.lane.b32.xlu1 %v2847_v41, %s2653_s2 }
 0x330   :  { %v608_v18 = vpop.xlane.xlu1 %607 }
 0x331   :  { %2434 = vrcp.f32 %v608_v18 }
 0x338   :  { %v611_v19 = vpop.xlane.xlu1 %610 }
 0x339   :  { %2436 = vrcp.f32 %v611_v19 }
 0x33c   :  { %v713_v30 = vpop.permute.xlu1 %712 }
 0x33e   :  { %v2435_v20 = vpop.eup %2434 }
 0x33f   :  { %v614_v22 = vmul.f32 %v2435_v20, %v2431_v3 }
 0x340   :  { %v768_v32 = vpop.permute.xlu1 %767 }
 0x341   :  { %v616_v23 = vpack.c.bf16 %v614_v22, %v614_v22  ;;  %v773_v33 = vsel %vm500_vm1, %v768_v32, 0 }
 0x343   :  { %2225 = vmatmul.mubr.msk.bf16.vlgmr.msra.gmra.mxu1 %vm593_vm2, %v616_v23 }
 0x344   :  { %2229 = vmatpush3.bf16.msra.mxu1 %v669_v24  ;;  %2230 = vmatprep.mubr.msk.bf16.mxu1 %vm2652_vm0, %v2651_v0  ;;  %v765_v34 = vpop.permute.xlu1 %764 }
 0x345   :  { %2234 = vmatprep.subr.bf16.mxu1 %v2651_v0 }
 0x346   :  { %v2437_v25 = vpop.eup %2436 }
 0x347   :  { %v615_v26 = vmul.f32 %v2437_v25, %v2433_v5 }
 0x349   :  { %v617_v29 = vpack.c.bf16 %v615_v26, %v615_v26 }
 0x34b   :  { %2231 = vmatmul.mubr.msk.bf16.vlgmr.msra.gmra.mxu1 %vm593_vm2, %v617_v29 }
 0x34c   :  { %2235 = vmatpush3.bf16.xpose.msra.mxu1 %v721_v31  ;;  %2236 = vmatprep.mubr.msk.bf16.mxu1 %vm2652_vm0, %v2651_v0 }
 0x34d   :  { %2240 = vmatprep.subr.bf16.mxu1 %v2651_v0 }
 0x353   :  { %2237 = vmatmul.mubr.msk.bf16.vlgmr.msra.gmra.mxu1 %vm500_vm1, %v713_v30 }
 0x354   :  { %2241 = vmatpush3.bf16.xpose.msra.mxu1 %v773_v33  ;;  %2242 = vmatprep.mubr.msk.bf16.mxu1 %vm2652_vm0, %v2651_v0 }
 0x355   :  { %2246 = vmatprep.subr.bf16.mxu1 %v2651_v0 }
 0x35b   :  { %2243 = vmatmul.mubr.msk.bf16.vlgmr.msra.gmra.mxu1 %vm500_vm1, %v765_v34 }
 0x35c   :  { %2248 = vmatprep.mubr.msk.bf16.mxu1 %vm2652_vm0, %v2651_v0 }
 0x403   :  { %v2905_v35 = vpop.f32.mrf.mxu1 }
 0x405   :  { %v2226_v38 = vpop.f32.mrf.mxu1 }
 0x407   :  { %v662_v39 = vpop.f32.mrf.mxu1 }
 0x409   :  { %v2227_v40 = vpop.f32.mrf.mxu1 }
 0x40b   :  { %v2907_v42 = vpop.f32.mrf.mxu1 }
 0x40d   :  { %v2232_v43 = vpop.f32.mrf.mxu1 }
 0x40f   :  { %v708_v44 = vpop.f32.mrf.mxu1 }
 0x411   :  { %v2233_v45 = vpop.f32.mrf.mxu1 }
 0x413   :  { %v757_v46 = vpop.f32.mrf.mxu1 }
 0x414   :  { %v815_v47 = vsel %vm593_vm2, %v757_v46, -inf }
 0x415   :  { %816 = vmax.xlane.f32.xlu0 %v815_v47  ;;  %v2238_v48 = vpop.f32.mrf.mxu1 }
 0x417   :  { %v760_v49 = vpop.f32.mrf.mxu1 }
 0x419   :  { %v2239_v50 = vpop.f32.mrf.mxu1 }
 0x41b   :  { %v809_v51 = vpop.f32.mrf.mxu1 }
 0x41c   :  { %v818_v52 = vsel %vm593_vm2, %v809_v51, -inf }
 0x41d   :  { %819 = vmax.xlane.f32.xlu1 %v818_v52  ;;  %v2244_v53 = vpop.f32.mrf.mxu1 }
 0x41f   :  { %v812_v54 = vpop.f32.mrf.mxu1 }
 0x421   :  { %v2245_v55 = vpop.f32.mrf.mxu1 }
 0x42e   :  { %889 = vrot.lane.b32.xlu1 %v2884_v21, %s2653_s2 }
 0x432   :  { %939 = vrot.lane.b32.xlu1 %v2831_v28, %s2641_s27 }
 0x436   :  { %989 = vrot.lane.b32.xlu1 %v2838_v37, %s2641_s27 }
 0x43a   :  { %987 = vrot.lane.b32.xlu1 %v2847_v41, %s2641_s27 }
 0x49e   :  { %v817_v56 = vpop.xlane.xlu0 %816 }
 0x49f   :  { %v821_v57 = vsub.f32 %v757_v46, %v817_v56 }
 0x4a1   :  { %v823_v58 = vmul.f32 1.442695, %v821_v57 }
 0x4a3   :  { %2438 = vpow2.f32 %v823_v58 }
 0x4a6   :  { %v820_v59 = vpop.xlane.xlu1 %819 }
 0x4a7   :  { %v822_v60 = vsub.f32 %v809_v51, %v820_v59 }
 0x4a9   :  { %v825_v61 = vmul.f32 1.442695, %v822_v60 }
 0x4aa   :  { %v890_v62 = vpop.permute.xlu1 %889 }
 0x4ab   :  { %2440 = vpow2.f32 %v825_v61  ;;  %v895_v15 = vsel %vm621_vm3, %v890_v62, 0 }
 0x4ae   :  { %v940_v63 = vpop.permute.xlu1 %939 }
 0x4af   :  { %v945_v1 = vsel %vm500_vm1, %v940_v63, 0 }
 0x4b0   :  { %v2439_v2 = vpop.eup %2438  ;;  %2259 = vmatpush3.bf16.xpose.msra.mxu0 %v945_v1 }
 0x4b1   :  { %v827_v3 = vsel %vm593_vm2, %v2439_v2, 0.0  ;;  %2270 = vmatprep.subr.bf16.mxu0 %v2651_v0 }
 0x4b2   :  { %828 = vadd.xlane.f32.xlu0 %v827_v3  ;;  %v990_v20 = vpop.permute.xlu1 %989 }
 0x4b3   :  { %v995_v23 = vsel %vm500_vm1, %v990_v20, 0 }
 0x4b6   :  { %v988_v24 = vpop.permute.xlu1 %987 }
 0x4b8   :  { %v2441_v4 = vpop.eup %2440 }
 0x4b9   :  { %v830_v5 = vsel %vm593_vm2, %v2441_v4, 0.0 }
 0x4ba   :  { %831 = vadd.xlane.f32.xlu0 %v830_v5 }
 0x4d0   :  { %840 = vrot.lane.b32.xlu0 %v2873_v14, %s2653_s2 }
 0x4d4   :  { %937 = vrot.lane.b32.xlu0 %v2836_v36, %s2641_s27 }
 0x53b   :  { %v829_v6 = vpop.xlane.xlu0 %828 }
 0x53c   :  { %2442 = vrcp.f32 %v829_v6 }
 0x543   :  { %v832_v7 = vpop.xlane.xlu0 %831 }
 0x544   :  { %2444 = vrcp.f32 %v832_v7 }
 0x547   :  { %v841_v8 = vpop.permute.xlu0 %840 }
 0x548   :  { %v846_v9 = vsel %vm621_vm3, %v841_v8, 0 }
 0x549   :  { %v2443_v10 = vpop.eup %2442  ;;  %2247 = vmatpush3.bf16.msra.mxu1 %v846_v9 }
 0x54a   :  { %2252 = vmatprep.subr.bf16.mxu1 %v2651_v0  ;;  %v835_v11 = vmul.f32 %v2443_v10, %v2439_v2 }
 0x54b   :  { %v938_v12 = vpop.permute.xlu0 %937 }
 0x54c   :  { %2261 = vmatmul.mubr.msk.bf16.vlgmr.msra.gmra.mxu0 %vm500_vm1, %v938_v12  ;;  %v837_v13 = vpack.c.bf16 %v835_v11, %v835_v11 }
 0x54d   :  { %2272 = vmatprep.mubr.msk.bf16.mxu0 %vm2652_vm0, %v2651_v0 }
 0x54e   :  { %2249 = vmatmul.mubr.msk.bf16.vlgmr.msra.gmra.mxu1 %vm593_vm2, %v837_v13 }
 0x54f   :  { %2253 = vmatpush3.bf16.msra.mxu1 %v895_v15  ;;  %2254 = vmatprep.mubr.msk.bf16.mxu1 %vm2652_vm0, %v2651_v0 }
 0x550   :  { %2264 = vmatprep.subr.bf16.mxu1 %v2651_v0 }
 0x551   :  { %v2445_v18 = vpop.eup %2444 }
 0x552   :  { %v836_v19 = vmul.f32 %v2445_v18, %v2441_v4 }
 0x554   :  { %v838_v22 = vpack.c.bf16 %v836_v19, %v836_v19 }
 0x556   :  { %2255 = vmatmul.mubr.msk.bf16.vlgmr.msra.gmra.mxu1 %vm593_vm2, %v838_v22 }
 0x557   :  { %2265 = vmatpush3.bf16.xpose.msra.mxu1 %v995_v23  ;;  %2266 = vmatprep.mubr.msk.bf16.mxu1 %vm2652_vm0, %v2651_v0 }
 0x558   :  { %2276 = vmatprep.subr.bf16.mxu1 %v2651_v0 }
 0x55e   :  { %2267 = vmatmul.mubr.msk.bf16.vlgmr.msra.gmra.mxu1 %vm500_vm1, %v988_v24 }
 0x55f   :  { %2278 = vmatprep.mubr.msk.bf16.mxu1 %vm2652_vm0, %v2651_v0 }
 0x60c   :  { %v981_v25 = vpop.f32.mrf.mxu0 }
 0x60d   :  { %v1037_v26 = vsel %vm593_vm2, %v981_v25, -inf }
 0x60e   :  { %v2946_v27 = vpop.f32.mrf.mxu1  ;;  %1038 = vmax.xlane.f32.xlu0 %v1037_v26  ;;  %v2262_v29 = vpop.f32.mrf.mxu0 }
 0x610   :  { %v2250_v30 = vpop.f32.mrf.mxu1  ;;  %v984_v31 = vpop.f32.mrf.mxu0 }
 0x612   :  { %v885_v32 = vpop.f32.mrf.mxu1  ;;  %v2263_v33 = vpop.f32.mrf.mxu0 }
 0x614   :  { %v2251_v34 = vpop.f32.mrf.mxu1 }
 0x616   :  { %v2948_v38 = vpop.f32.mrf.mxu1 }
 0x617   :  { %v2343_v39 = vpack.i.bf16 %v2948_v38, %v2946_v27 }
 0x618   :  { %v2256_v40 = vpop.f32.mrf.mxu1 }
 0x61a   :  { %v934_v43 = vpop.f32.mrf.mxu1 }
 0x61c   :  { %v2257_v44 = vpop.f32.mrf.mxu1 }
 0x61e   :  { %v1031_v45 = vpop.f32.mrf.mxu1 }
 0x61f   :  { %v1040_v46 = vsel %vm593_vm2, %v1031_v45, -inf }
 0x620   :  { %1041 = vmax.xlane.f32.xlu1 %v1040_v46  ;;  %v2268_v47 = vpop.f32.mrf.mxu1 }
 0x622   :  { %v1034_v48 = vpop.f32.mrf.mxu1 }
 0x624   :  { %v2269_v49 = vpop.f32.mrf.mxu1 }
 0x631   :  { %1109 = vrot.lane.b32.xlu1 %v2884_v21, %s2641_s27 }
 0x635   :  { %1159 = vrot.lane.b32.xlu1 %v2831_v28, %s2654_s6 }
 0x639   :  { %1209 = vrot.lane.b32.xlu1 %v2838_v37, %s2654_s6 }
 0x63d   :  { %1207 = vrot.lane.b32.xlu1 %v2847_v41, %s2654_s6 }
 0x697   :  { %v1039_v50 = vpop.xlane.xlu0 %1038 }
 0x698   :  { %v1043_v51 = vsub.f32 %v981_v25, %v1039_v50 }
 0x69a   :  { %v1045_v52 = vmul.f32 1.442695, %v1043_v51 }
 0x69c   :  { %2446 = vpow2.f32 %v1045_v52 }
 0x6a9   :  { %v2447_v53 = vpop.eup %2446  ;;  %v1042_v54 = vpop.xlane.xlu1 %1041 }
 0x6aa   :  { %v1044_v55 = vsub.f32 %v1031_v45, %v1042_v54  ;;  %v1049_v56 = vsel %vm593_vm2, %v2447_v53, 0.0 }
 0x6ab   :  { %1050 = vadd.xlane.f32.xlu0 %v1049_v56 }
 0x6ac   :  { %v1047_v57 = vmul.f32 1.442695, %v1044_v55 }
 0x6ad   :  { %v1110_v58 = vpop.permute.xlu1 %1109 }
 0x6ae   :  { %2448 = vpow2.f32 %v1047_v57  ;;  %v1115_v28 = vsel %vm621_vm3, %v1110_v58, 0 }
 0x6af   :  { %2277 = vmatpush3.bf16.msra.mxu1 %v1115_v28 }
 0x6b0   :  { %2288 = vmatprep.subr.bf16.mxu1 %v2651_v0 }
 0x6b1   :  { %v1160_v2 = vpop.permute.xlu1 %1159 }
 0x6b2   :  { %v1165_v4 = vsel %vm500_vm1, %v1160_v2, 0  ;;  %v2389_v2 = vld [vmem:[#allocation10] sm:$0xff]  }
 0x6b5   :  { %v1210_v6 = vpop.permute.xlu1 %1209 }
 0x6b6   :  { %v1215_v9 = vsel %vm500_vm1, %v1210_v6, 0 }
 0x6b9   :  { %v1208_v10 = vpop.permute.xlu1 %1207 }
 0x6bb   :  { %v2449_v37 = vpop.eup %2448 }
 0x6bc   :  { %v1052_v41 = vsel %vm593_vm2, %v2449_v37, 0.0 }
 0x6bd   :  { %1053 = vadd.xlane.f32.xlu0 %v1052_v41  ;;  %v2383_v41 = vld [vmem:[#allocation10 + $0x30] sm:$0xff]  }
 0x6d3   :  { %1061 = vrot.lane.b32.xlu0 %v2873_v14, %s2641_s27 }
 0x6d7   :  { %1157 = vrot.lane.b32.xlu0 %v2836_v36, %s2654_s6 }
 0x734   :  { %v1051_v59 = vpop.xlane.xlu0 %1050 }
 0x735   :  { %2450 = vrcp.f32 %v1051_v59  ;;  %v2384_v59 = vld [vmem:[#allocation10 + $0x28] sm:$0xff]  }
 0x742   :  { %v2451_v60 = vpop.eup %2450 }
 0x743   :  { %v1057_v62 = vmul.f32 %v2451_v60, %v2447_v53  ;;  %v2385_v60 = vld [vmem:[#allocation10 + $0x20] sm:$0xff]  }
 0x745   :  { %v1059_v3 = vpack.c.bf16 %v1057_v62, %v1057_v62  ;;  %v2387_v62 = vld [vmem:[#allocation10 + $0x10] sm:$0xff]  }
 0x746   :  { %v1054_v61 = vpop.xlane.xlu0 %1053 }
 0x747   :  { %2452 = vrcp.f32 %v1054_v61  ;;  %v2386_v61 = vld [vmem:[#allocation10 + $0x18] sm:$0xff]  }
 0x74a   :  { %v1062_v63 = vpop.permute.xlu0 %1061 }
 0x74b   :  { %v1067_v1 = vsel %vm621_vm3, %v1062_v63, 0  ;;  %v2388_v63 = vld [vmem:[#allocation10 + $0x8] sm:$0xff]  }
 0x74c   :  { %2271 = vmatpush3.bf16.msra.mxu0 %v1067_v1 }
 0x74d   :  { %2282 = vmatprep.subr.bf16.mxu0 %v2651_v0 }
 0x74e   :  { %v1158_v7 = vpop.permute.xlu0 %1157 }
 0x74f   :  { %2273 = vmatmul.mubr.msk.bf16.vlgmr.msra.gmra.mxu0 %vm593_vm2, %v1059_v3 }
 0x750   :  { %2283 = vmatpush3.bf16.xpose.msra.mxu0 %v1165_v4  ;;  %2284 = vmatprep.mubr.msk.bf16.mxu0 %vm2652_vm0, %v2651_v0 }
 0x751   :  { %2294 = vmatprep.subr.bf16.mxu0 %v2651_v0 }
 0x754   :  { %v2453_v36 = vpop.eup %2452 }
 0x755   :  { %v1058_v5 = vmul.f32 %v2453_v36, %v2449_v37  ;;  %v2382_v37 = vld [vmem:[#allocation10 + $0x38] sm:$0xff]  }
 0x757   :  { %2285 = vmatmul.mubr.msk.bf16.vlgmr.msra.gmra.mxu0 %vm500_vm1, %v1158_v7  ;;  %v1060_v8 = vpack.c.bf16 %v1058_v5, %v1058_v5 }
 0x758   :  { %2296 = vmatprep.mubr.msk.bf16.mxu0 %vm2652_vm0, %v2651_v0 }
 0x759   :  { %2279 = vmatmul.mubr.msk.bf16.vlgmr.msra.gmra.mxu1 %vm593_vm2, %v1060_v8 }
 0x75a   :  { %2289 = vmatpush3.bf16.xpose.msra.mxu1 %v1215_v9  ;;  %2290 = vmatprep.mubr.msk.bf16.mxu1 %vm2652_vm0, %v2651_v0 }
 0x75b   :  { %2300 = vmatprep.subr.bf16.mxu1 %v2651_v0 }
 0x761   :  { %2291 = vmatmul.mubr.msk.bf16.vlgmr.msra.gmra.mxu1 %vm500_vm1, %v1208_v10 }
 0x762   :  { %2302 = vmatprep.mubr.msk.bf16.mxu1 %vm2652_vm0, %v2651_v0 }
 0x80f   :  { %v1103_v11 = vpop.f32.mrf.mxu0 }
 0x811   :  { %v2274_v12 = vpop.f32.mrf.mxu0 }
 0x813   :  { %v1106_v13 = vpop.f32.mrf.mxu0 }
 0x815   :  { %v2275_v15 = vpop.f32.mrf.mxu0 }
 0x817   :  { %v1201_v18 = vpop.f32.mrf.mxu0 }
 0x818   :  { %v1257_v19 = vsel %vm593_vm2, %v1201_v18, -inf }
 0x819   :  { %v1151_v20 = vpop.f32.mrf.mxu1  ;;  %1258 = vmax.xlane.f32.xlu0 %v1257_v19  ;;  %v2286_v22 = vpop.f32.mrf.mxu0 }
 0x81a   :  { %v2348_v40 = vpack.i.bf16 %v1151_v20, %v1103_v11 }
 0x81b   :  { %v2280_v23 = vpop.f32.mrf.mxu1  ;;  %v1204_v24 = vpop.f32.mrf.mxu0 }
 0x81d   :  { %v1154_v25 = vpop.f32.mrf.mxu1  ;;  %v2287_v26 = vpop.f32.mrf.mxu0 }
 0x81f   :  { %v2281_v29 = vpop.f32.mrf.mxu1 }
 0x821   :  { %v1251_v30 = vpop.f32.mrf.mxu1 }
 0x822   :  { %v1260_v31 = vsel %vm593_vm2, %v1251_v30, -inf }
 0x823   :  { %1261 = vmax.xlane.f32.xlu1 %v1260_v31  ;;  %v2292_v32 = vpop.f32.mrf.mxu1  ;;  %v2014_v31 = vld [vmem:[%s3068_s8] ss:$0 sm:$0xff] }
 0x825   :  { %v1254_v33 = vpop.f32.mrf.mxu1 }
 0x827   :  { %v2293_v34 = vpop.f32.mrf.mxu1 }
 0x834   :  { %1329 = vrot.lane.b32.xlu1 %v2884_v21, %s2654_s6 }
 0x838   :  { %2344 = vrot.lane.b32.xlu1 %v2343_v39, %s2654_s6 }
 0x83c   :  { %2349 = vrot.lane.b32.xlu1 %v2348_v40, %s2641_s27 }
 0x8a2   :  { %v1259_v43 = vpop.xlane.xlu0 %1258 }
 0x8a3   :  { %v1263_v44 = vsub.f32 %v1201_v18, %v1259_v43 }
 0x8a5   :  { %v1265_v45 = vmul.f32 1.442695, %v1263_v44 }
 0x8a7   :  { %2454 = vpow2.f32 %v1265_v45 }
 0x8ac   :  { %v1262_v46 = vpop.xlane.xlu1 %1261 }
 0x8ad   :  { %v1264_v47 = vsub.f32 %v1251_v30, %v1262_v46 }
 0x8af   :  { %v1267_v48 = vmul.f32 1.442695, %v1264_v47  ;;  %v2390_v47 = vld [vmem:[#allocation11 + $0x70] ss:$8 sps:$4 sm:$0xff]  }
 0x8b0   :  { %v1330_v49 = vpop.permute.xlu1 %1329 }
 0x8b1   :  { %2456 = vpow2.f32 %v1267_v48  ;;  %v1335_v50 = vsel %vm621_vm3, %v1330_v49, 0  ;;  %v2395_v48 = vld [vmem:[#allocation11 + $0x64] ss:$8 sps:$4 sm:$0xff]   ;;  %v2393_v49 = vld [vmem:[#allocation11 + $0x60] ss:$8 sps:$4 sm:$0xff]  }
 0x8b2   :  { %2301 = vmatpush3.bf16.msra.mxu1 %v1335_v50  ;;  %v2398_v50 = vld [vmem:[#allocation11 + $0x54] ss:$8 sps:$4 sm:$0xff]  }
 0x8b4   :  { %v2455_v21 = vpop.eup %2454  ;;  %v2345_v10 = vpop.permute.xlu1 %2344 }
 0x8b5   :  { %v1269_v51 = vsel %vm593_vm2, %v2455_v21, 0.0  ;;  %v2347_v12 = vunpack.i.h.bf16 %v2345_v10  ;;  %v2346_v13 = vunpack.i.l.bf16 %v2345_v10 }
 0x8b6   :  { %1270 = vadd.xlane.f32.xlu0 %v1269_v51  ;;  %v2401_v51 = vld [vmem:[#allocation11 + $0x44] ss:$8 sps:$4 sm:$0xff]  }
 0x8b7   :  { %v1402_v19 = vsel %vm500_vm1, %v2907_v42, %v2347_v12  ;;  %v1401_v20 = vsel %vm500_vm1, %v2905_v35, %v2346_v13 }
 0x8b8   :  { %v2350_v11 = vpop.permute.xlu1 %2349 }
 0x8b9   :  { %v2352_v15 = vunpack.i.h.bf16 %v2350_v11  ;;  %v2351_v18 = vunpack.i.l.bf16 %v2350_v11 }
 0x8bb   :  { %v1405_v24 = vsel %vm1403_vm4, %v1402_v19, %v2352_v15  ;;  %v1404_v25 = vsel %vm1403_vm4, %v1401_v20, %v2351_v18  ;;  %v2023_v19 = vld [vmem:[%s3069_s9] ss:$0 sm:$0xff] }
 0x8be   :  { %v2457_v27 = vpop.eup %2456 }
 0x8bf   :  { %v1272_v38 = vsel %vm593_vm2, %v2457_v27, 0.0 }
 0x8c0   :  { %1273 = vadd.xlane.f32.xlu0 %v1272_v38  ;;  %v2402_v38 = vld [vmem:[#allocation11 + $0x30] ss:$8 sps:$4 sm:$0xff]  }
 0x8d6   :  { %1281 = vrot.lane.b32.xlu0 %v2873_v14, %s2654_s6 }
 0x93f   :  { %v1271_v39 = vpop.xlane.xlu0 %1270 }
 0x940   :  { %2458 = vrcp.f32 %v1271_v39  ;;  %v2655_v39 = vmov 0  }
 0x949   :  { %v1274_v52 = vpop.xlane.xlu0 %1273 }
 0x94a   :  { %2460 = vrcp.f32 %v1274_v52  ;;  %v2407_v52 = vld [vmem:[#allocation11 + $0x24] ss:$8 sps:$4 sm:$0xff]  }
 0x94d   :  { %v2459_v53 = vpop.eup %2458  ;;  %v1282_v54 = vpop.permute.xlu0 %1281 }
 0x94e   :  { %v1287_v55 = vsel %vm621_vm3, %v1282_v54, 0  ;;  %v1277_v56 = vmul.f32 %v2459_v53, %v2455_v21  ;;  %v2396_v21 = vld [vmem:[#allocation11 + $0x50] ss:$8 sps:$4 sm:$0xff]   ;;  %v2405_v53 = vld [vmem:[#allocation11 + $0x20] ss:$8 sps:$4 sm:$0xff]  }
 0x94f   :  { %2295 = vmatpush3.bf16.msra.mxu0 %v1287_v55  ;;  %v2410_v54 = vld [vmem:[#allocation11 + $0x14] ss:$8 sps:$4 sm:$0xff]   ;;  %v2408_v55 = vld [vmem:[#allocation11 + $0x10] ss:$8 sps:$4 sm:$0xff]  }
 0x950   :  { %v1279_v57 = vpack.c.bf16 %v1277_v56, %v1277_v56  ;;  %2306 = vmatprep.subr.bf16.mxu0 %v2651_v0  ;;  %v2413_v56 = vld [vmem:[#allocation11 + $0x4] ss:$8 sps:$4 sm:$0xff]  }
 0x952   :  { %2297 = vmatmul.mubr.msk.bf16.vlgmr.msra.gmra.mxu0 %vm593_vm2, %v1279_v57  ;;  %v2411_v57 = vld [vmem:[#allocation11] ss:$8 sps:$4 sm:$0xff]  }
 0x953   :  { %2322 = vmatprep.mubr.msk.bf16.mxu0 %vm2652_vm0, %v2651_v0  ;;  %2307 = vmatpush3.bf16.msra.mxu0 %v2382_v37  ;;  %v2417_v37 = vld [vmem:[#allocation13 + $0x30] sm:$0xff]  }
 0x954   :  { %2308 = vmatprep.subr.bf16.mxu0 %v2651_v0 }
 0x957   :  { %v2461_v58 = vpop.eup %2460  ;;  %2309 = vmatpush3.bf16.msra.mxu0 %v2383_v41  ;;  %v2418_v41 = vld [vmem:[#allocation13 + $0x68] sm:$0xff]  }
 0x958   :  { %v1278_v14 = vmul.f32 %v2461_v58, %v2457_v27  ;;  %2310 = vmatprep.subr.bf16.mxu0 %v2651_v0  ;;  %v2404_v27 = vld [vmem:[#allocation11 + $0x34] ss:$8 sps:$4 sm:$0xff]  }
 0x959   :  { %v2414_v58 = vld [vmem:[#allocation13 + $0x78] sm:$0xff]  }
 0x95a   :  { %v1280_v28 = vpack.c.bf16 %v1278_v14, %v1278_v14  ;;  %v2415_v14 = vld [vmem:[#allocation13 + $0x38] sm:$0xff]  }
 0x95b   :  { %2311 = vmatpush3.bf16.msra.mxu0 %v2384_v59  ;;  %v2419_v59 = vld [vmem:[#allocation13 + $0x28] sm:$0xff]  }
 0x95c   :  { %2303 = vmatmul.mubr.msk.bf16.vlgmr.msra.gmra.mxu1 %vm593_vm2, %v1280_v28  ;;  %2312 = vmatprep.subr.bf16.mxu0 %v2651_v0  ;;  %v2416_v28 = vld [vmem:[#allocation13 + $0x70] sm:$0xff]  }
 0x95d   :  { %1710 = vmatprep.mubr.bf16.mxu1 %v2655_v39 }
 0x95f   :  { %2313 = vmatpush3.bf16.msra.mxu0 %v2385_v60  ;;  %v2420_v60 = vld [vmem:[#allocation13 + $0x60] sm:$0xff]  }
 0x960   :  { %2314 = vmatprep.subr.bf16.mxu0 %v2651_v0 }
 0x963   :  { %2315 = vmatpush3.bf16.msra.mxu0 %v2386_v61  ;;  %v2421_v61 = vld [vmem:[#allocation13 + $0x20] sm:$0xff]  }
 0x964   :  { %2316 = vmatprep.subr.bf16.mxu0 %v2651_v0 }
 0x967   :  { %2317 = vmatpush3.bf16.msra.mxu0 %v2387_v62  ;;  %v2422_v62 = vld [vmem:[#allocation13 + $0x58] sm:$0xff]  }
 0x968   :  { %2318 = vmatprep.subr.bf16.mxu0 %v2651_v0 }
 0x96b   :  { %2319 = vmatpush3.bf16.msra.mxu0 %v2388_v63  ;;  %v2423_v63 = vld [vmem:[#allocation13 + $0x18] sm:$0xff]  }
 0x96c   :  { %2320 = vmatprep.subr.bf16.mxu0 %v2651_v0 }
 0x96f   :  { %2321 = vmatpush3.bf16.msra.mxu0 %v2389_v2 }
 0x970   :  { %2128 = vmatprep.subr.bf16.mxu0 %v2414_v58 }
 0xa12   :  { %v1323_v1 = vpop.f32.mrf.mxu0 }
 0xa14   :  { %v2298_v3 = vpop.f32.mrf.mxu0 }
 0xa16   :  { %v1326_v4 = vpop.f32.mrf.mxu0 }
 0xa18   :  { %v2299_v36 = vpop.f32.mrf.mxu0 }
 0xa1c   :  { %v1371_v5 = vpop.f32.mrf.mxu1 }
 0xa1d   :  { %v2353_v6 = vpack.i.bf16 %v1371_v5, %v1323_v1 }
 0xa1e   :  { %v2304_v7 = vpop.f32.mrf.mxu1 }
 0xa1f   :  { %2354 = vrot.lane.b32.xlu0 %v2353_v6, %s2653_s2 }
 0xa20   :  { %v1374_v8 = vpop.f32.mrf.mxu1 }
 0xa22   :  { %v2305_v9 = vpop.f32.mrf.mxu1 }
 0xa91   :  { %v2355_v0 = vpop.permute.xlu0 %2354 }
 0xa92   :  { %v2357_v22 = vunpack.i.h.bf16 %v2355_v0  ;;  %v2356_v23 = vunpack.i.l.bf16 %v2355_v0 }
 0xa94   :  { %v1408_v26 = vsel %vm1406_vm5, %v1405_v24, %v2357_v22  ;;  %v1407_v29 = vsel %vm1406_vm5, %v1404_v25, %v2356_v23  ;;  %v2024_v25 = vld [vmem:[%s3070_s10] ss:$0 sm:$0xff] }
 0xa95   :  { %v1409_v30 = vpack.c.bf16 %v1408_v26, %v1407_v29 }
 0xa97   :  { %2323 = vmatmul.mubr.bf16.vlgmr.msra.gmra.mxu0 %v1409_v30 }
 0xa98   :  { %2129 = vmatpush3.bf16.msra.mxu0 %v2415_v14  ;;  %v2041_v14 = vld [vmem:[%s3074_s14] ss:$0 sm:$0xff] }
 0xa99   :  { %2130 = vmatprep.subr.bf16.mxu0 %v2416_v28 }
 0xa9c   :  { %2131 = vmatpush3.bf16.msra.mxu0 %v2417_v37 }
 0xa9d   :  { %2132 = vmatprep.subr.bf16.mxu0 %v2418_v41 }
 0xaa0   :  { %2133 = vmatpush3.bf16.msra.mxu0 %v2419_v59 }
 0xaa1   :  { %2134 = vmatprep.subr.bf16.mxu0 %v2420_v60 }
 0xaa4   :  { %2135 = vmatpush3.bf16.msra.mxu0 %v2421_v61 }
 0xaa5   :  { %2136 = vmatprep.subr.bf16.mxu0 %v2422_v62 }
 0xaa8   :  { %2137 = vmatpush3.bf16.msra.mxu0 %v2423_v63 }
 0xb57   :  { %v1515_v32 = vpop.f32.mrf.mxu0 }
 0xb58   :  { %v1516_v33 = vadd.f32 %v2014_v31, %v1515_v32  ;;  %v2424_v32 = vld [vmem:[#allocation13 + $0x50] sm:$0xff]  }
 0xb59   :  { %v2324_v34 = vpop.f32.mrf.mxu0  ;;  %2138 = vmatprep.subr.bf16.mxu0 %v2424_v32 }
 0xb5a   :  { %v3023_v42 = vadd.f32 %v1516_v33, %v2807_v16  ;;  %v2392_v16 = vld [vmem:[#allocation11 + $0x74] ss:$8 sps:$4 sm:$0xff]   ;;  %v2426_v34 = vld [vmem:[#allocation13 + $0x48] sm:$0xff]  }
 0xb5b   :  { %v1518_v40 = vpop.f32.mrf.mxu0  ;;  %1678 = vmatprep.subr.bf16.mxu1 %v2392_v16  ;;  %v2425_v33 = vld [vmem:[#allocation13 + $0x10] sm:$0xff]  }
 0xb5c   :  { %v1519_v35 = vadd.f32 %v2014_v31, %v1518_v40  ;;  %1524 = vadd.xlane.f32.xlu1 %v3023_v42  ;;  %v1531_v43 = vmul.f32 %v3023_v42, %v3023_v42  ;;  %1679 = vmatpush1.bf16.msra.mxu1 %v2390_v47  ;;  %v2428_v40 = vld [vmem:[#allocation13 + $0x40] sm:$0xff]   ;;  %v1586_v16 = vld [vmem:[%s3072_s12] sm:$0x3] }
 0xb5d   :  { %v2325_v44 = vpop.f32.mrf.mxu0  ;;  %1680 = vmatprep.subr.bf16.mxu1 %v2395_v48  ;;  %2139 = vmatpush3.bf16.msra.mxu0 %v2425_v33 }
 0xb5e   :  { %1533 = vadd.xlane.f32.xlu0 %v1531_v43  ;;  %v3029_v45 = vadd.f32 %v1519_v35, %v2809_v17  ;;  %v2399_v17 = vld [vmem:[#allocation11 + $0x40] ss:$8 sps:$4 sm:$0xff]   ;;  %2140 = vmatprep.subr.bf16.mxu0 %v2426_v34  ;;  %v1588_v43 = vlaneseq }
 0xb5f   :  { %v2429_v35 = vld [vmem:[#allocation13] sm:$0xff]  }
 0xb60   :  { %v1532_v46 = vmul.f32 %v3029_v45, %v3029_v45  ;;  %1681 = vmatpush1.bf16.msra.mxu1 %v2393_v49  ;;  %v1589_v44 = vshrl.u32 %v1588_v43, 7 }
 0xb61   :  { %1682 = vmatprep.subr.bf16.mxu1 %v2398_v50 }
 0xb62   :  { %1526 = vadd.xlane.f32.xlu0 %v3029_v45 }
 0xb64   :  { %1683 = vmatpush1.bf16.msra.mxu1 %v2396_v21 }
 0xb65   :  { %1684 = vmatprep.subr.bf16.mxu1 %v2401_v51 }
 0xb66   :  { %1535 = vadd.xlane.f32.xlu0 %v1532_v46  ;;  %v1590_v46 = vsub.s32 0, %v1589_v44 }
 0xb68   :  { %1685 = vmatpush1.bf16.msra.mxu1 %v2399_v17  ;;  %v1591_v49 = vrot.slane %v1586_v16, %v1590_v46 }
 0xb69   :  { %1686 = vmatprep.subr.bf16.mxu1 %v2404_v27 }
 0xb6c   :  { %1687 = vmatpush1.bf16.msra.mxu1 %v2402_v38 }
 0xb6d   :  { %1688 = vmatprep.subr.bf16.mxu1 %v2407_v52 }
 0xb70   :  { %1689 = vmatpush1.bf16.msra.mxu1 %v2405_v53 }
 0xb71   :  { %1690 = vmatprep.subr.bf16.mxu1 %v2410_v54 }
 0xb74   :  { %1691 = vmatpush1.bf16.msra.mxu1 %v2408_v55 }
 0xb75   :  { %1692 = vmatprep.subr.bf16.mxu1 %v2413_v56 }
 0xb78   :  { %1693 = vmatpush1.bf16.msra.mxu1 %v2411_v57 }
 0xbe5   :  { %v1525_v1 = vpop.xlane.xlu1 %1524 }
 0xbe6   :  { %v1529_v2 = vmul.f32 0.0078125, %v1525_v1 }
 0xbe7   :  { %v1534_v3 = vpop.xlane.xlu0 %1533 }
 0xbe8   :  { %v1539_v4 = vmul.f32 %v1529_v2, %v1529_v2  ;;  %v1537_v36 = vmul.f32 0.0078125, %v1534_v3  ;;  %v1543_v18 = vsub.f32 %v3023_v42, %v1529_v2  ;;  %v2427_v42 = vld [vmem:[#allocation13 + $0x8] sm:$0xff]  }
 0xbe9   :  { %2141 = vmatpush3.bf16.msra.mxu0 %v2427_v42 }
 0xbea   :  { %v1541_v5 = vsub.f32 %v1537_v36, %v1539_v4  ;;  %2142 = vmatprep.subr.bf16.mxu0 %v2428_v40 }
 0xbeb   :  { %v1527_v6 = vpop.xlane.xlu0 %1526 }
 0xbec   :  { %v1545_v7 = vadd.f32 1e-05, %v1541_v5  ;;  %v1530_v8 = vmul.f32 0.0078125, %v1527_v6 }
 0xbed   :  { %2143 = vmatpush3.bf16.msra.mxu0 %v2429_v35 }
 0xbee   :  { %2462 = vrsqrt.f32 %v1545_v7  ;;  %v1540_v10 = vmul.f32 %v1530_v8, %v1530_v8  ;;  %v1544_v20 = vsub.f32 %v3029_v45, %v1530_v8  ;;  %v1594_v45 = vsub.s32 1, %v1589_v44 }
 0xbef   :  { %v1536_v9 = vpop.xlane.xlu0 %1535 }
 0xbf0   :  { %v1538_v11 = vmul.f32 0.0078125, %v1536_v9  ;;  %v1595_v48 = vrot.slane %v1586_v16, %v1594_v45 }
 0xbf2   :  { %v1542_v12 = vsub.f32 %v1538_v11, %v1540_v10 }
 0xbf4   :  { %v1546_v13 = vadd.f32 1e-05, %v1542_v12 }
 0xbf6   :  { %2464 = vrsqrt.f32 %v1546_v13 }
 0xbfb   :  { %v2463_v15 = vpop.eup %2462 }
 0xbfc   :  { %v1549_v0 = vmul.f32 %v2463_v15, %v1543_v18 }
 0xbfe   :  { %v1558_v24 = vmul.f32 %v2023_v19, %v1549_v0 }
 0xc00   :  { %v1567_v29 = vadd.f32 %v2024_v25, %v1558_v24  ;;  %v2059_v24 = vld [vmem:[%s3076_s16] ss:$0 sm:$0xff] }
 0xc03   :  { %v2465_v22 = vpop.eup %2464 }
 0xc04   :  { %v1550_v23 = vmul.f32 %v2465_v22, %v1544_v20  ;;  %v2058_v22 = vld [vmem:[%s3075_s15] ss:$0 sm:$0xff] }
 0xc06   :  { %v1559_v26 = vmul.f32 %v2023_v19, %v1550_v23 }
 0xc08   :  { %v1568_v30 = vadd.f32 %v2024_v25, %v1559_v26 }
 0xc0a   :  { %v1569_v31 = vpack.c.bf16 %v1568_v30, %v1567_v29 }
 0xc0c   :  { %1711 = vmatmul.mubr.bf16.vlgmr.msra.gmra.mxu1 %v1569_v31 }
 0xccc   :  { %v1712_v47 = vpop.f32.mrf.mxu1 }
 0xccd   :  { %v1713_v27 = vadd.f32 %v1712_v47, %v1591_v49 }
 0xcce   :  { %v1714_v50 = vpop.f32.mrf.mxu1 }
 0xccf   :  { %v1715_v17 = vadd.f32 %v1714_v50, %v1595_v48  ;;  %v1721_v55 = vmax.f32 %v1713_v27, 0.0 }
 0xcd0   :  { %v1716_v21 = vpop.f32.mrf.mxu1 }
 0xcd1   :  { %v1717_v51 = vadd.f32 %v1716_v21, %v1591_v49  ;;  %v1722_v53 = vmax.f32 %v1715_v17, 0.0 }
 0xcd2   :  { %v1718_v38 = vpop.f32.mrf.mxu1 }
 0xcd3   :  { %v1719_v39 = vadd.f32 %v1718_v38, %v1595_v48  ;;  %v1723_v52 = vmax.f32 %v1717_v51, 0.0 }
 0xcd5   :  { %v1724_v54 = vmax.f32 %v1719_v39, 0.0  ;;  %v1725_v57 = vpack.c.bf16 %v1723_v52, %v1721_v55 }
 0xcd7   :  { %v1726_v56 = vpack.c.bf16 %v1724_v54, %v1722_v53 }
 0xcd9   :  { %1894 = vmatprep.mubr.bf16.mxu0 %v1726_v56 }
 0xcda   :  { %1895 = vmatmul.mubr.bf16.vlgmr.msra.gmra.mxu0 %v1725_v57 }
 0xd9a   :  { %v2144_v58 = vpop.f32.mrf.mxu0 }
 0xd9c   :  { %v2145_v28 = vpop.f32.mrf.mxu0 }
 0xd9d   :  { %v2146_v37 = vadd.f32 %v2145_v28, %v2144_v58 }
 0xd9e   :  { %v2147_v41 = vpop.f32.mrf.mxu0 }
 0xd9f   :  { %v1897_v59 = vadd.f32 %v2146_v37, %v2041_v14 }
 0xda0   :  { %v2148_v60 = vpop.f32.mrf.mxu0 }
 0xda1   :  { %v2149_v61 = vadd.f32 %v2148_v60, %v2147_v41  ;;  %v1903_v62 = vadd.f32 %v1897_v59, %v1567_v29 }
 0xda3   :  { %v1900_v63 = vadd.f32 %v2149_v61, %v2041_v14  ;;  %1905 = vadd.xlane.f32.xlu1 %v1903_v62  ;;  %v1911_v2 = vmul.f32 %v1903_v62, %v1903_v62 }
 0xda5   :  { %v1904_v1 = vadd.f32 %v1900_v63, %v1568_v30 }
 0xda7   :  { %1907 = vadd.xlane.f32.xlu0 %v1904_v1  ;;  %1913 = vadd.xlane.f32.xlu1 %v1911_v2  ;;  %v1912_v3 = vmul.f32 %v1904_v1, %v1904_v1 }
 0xdab   :  { %1915 = vadd.xlane.f32.xlu0 %v1912_v3 }
 0xe2c   :  { %v1906_v4 = vpop.xlane.xlu1 %1905 }
 0xe2d   :  { %v1909_v36 = vmul.f32 0.0078125, %v1906_v4 }
 0xe2f   :  { %v1919_v7 = vmul.f32 %v1909_v36, %v1909_v36  ;;  %v1923_v19 = vsub.f32 %v1903_v62, %v1909_v36 }
 0xe30   :  { %v1908_v5 = vpop.xlane.xlu0 %1907  ;;  %v1914_v6 = vpop.xlane.xlu1 %1913 }
 0xe31   :  { %v1910_v8 = vmul.f32 0.0078125, %v1908_v5  ;;  %v1917_v9 = vmul.f32 0.0078125, %v1914_v6 }
 0xe33   :  { %v1921_v10 = vsub.f32 %v1917_v9, %v1919_v7  ;;  %v1920_v12 = vmul.f32 %v1910_v8, %v1910_v8  ;;  %v1924_v25 = vsub.f32 %v1904_v1, %v1910_v8 }
 0xe34   :  { %v1916_v11 = vpop.xlane.xlu0 %1915 }
 0xe35   :  { %v1925_v13 = vadd.f32 1e-05, %v1921_v10  ;;  %v1918_v15 = vmul.f32 0.0078125, %v1916_v11 }
 0xe37   :  { %2466 = vrsqrt.f32 %v1925_v13  ;;  %v1922_v18 = vsub.f32 %v1918_v15, %v1920_v12 }
 0xe39   :  { %v1926_v0 = vadd.f32 1e-05, %v1922_v18 }
 0xe3b   :  { %2468 = vrsqrt.f32 %v1926_v0 }
 0xe44   :  { %v2467_v20 = vpop.eup %2466 }
 0xe45   :  { %v1929_v23 = vmul.f32 %v2467_v20, %v1923_v19 }
 0xe47   :  { %v1938_v26 = vmul.f32 %v2058_v22, %v1929_v23 }
 0xe48   :  { %v2469_v29 = vpop.eup %2468 }
 0xe49   :  { %v1930_v30 = vmul.f32 %v2469_v29, %v1924_v25  ;;  %v1947_v31 = vadd.f32 %v2059_v24, %v1938_v26 }
 0xe4b   :  { %v1939_v32 = vmul.f32 %v2058_v22, %v1930_v30  ;;  %1949 = vst [vmem:[#allocation14] sm:$0xff] %v1947_v31 }
 0xe4d   :  { %v1948_v33 = vadd.f32 %v2059_v24, %v1939_v32 }
 0xe4f   :  { %1950 = vst [vmem:[#allocation14 + $0x8] sm:$0xff] %v1948_v33 }
 0xe50   :  { %2621 = shalt.err (!%p2618_p11)
}
 0xe51   :  { %1962 = dma.vmem_to_hbm [thread:$0]  %s1957_s20, 256, %s3077_s17, [#allocation4], %s2646_s29, %s2646_s29, %s2647_s0  }
 0xe52   :  { %2638 = dma.done.wait [#allocation4], 256  }
 0xe53   :  { %2639 = vsyncadd [#allocation4], 4294967040 }
 0xe54   :  { %1966 = vsyncpa [#allocation3], 1 }
 0xe55   :  { %1967 = vsyncpa [#allocation6], 1 }
 0xe56   :  { %1968 = vsyncpa [#allocation9], 1 }
 0xe57   :  { %1969 = vsyncpa [#allocation12], 1 }
 0xe58   :  { %1970 = vsyncpa [#allocation4], 1 }

</bundles_post_ra>
